<compile_context>
chip_gen: v5e
topology: v5e:2x2
jax: 0.10.0
libtpu: 0.0.40
codegen_flags: <defaults>
</compile_context>

<pallas_src>
import functools

import jax
import jax.numpy as jnp
from jax import lax
from jax.experimental import pallas as pl
from jax.experimental.pallas import tpu as pltpu


def _vmem_limit_bytes():
    """Per-generation scoped-VMEM budget (v5e/v6e: 128 MiB parts; v7x: 64 MiB)."""
    try:
        dev = jax.devices()[0]
        if dev.platform == "tpu":
            kind = (getattr(dev, "device_kind", "") or "").lower()
            if "v5" in kind or "v6" in kind:
                return 96 * 1024 * 1024
    except Exception:
        pass
    return 48 * 1024 * 1024


_VMEM_LIMIT = _vmem_limit_bytes()


def _largest_divisor_le(n, target):
    t = max(1, min(n, target))
    while n % t:
        t -= 1
    return t


def _pick_conv_row_tile(H, W):
    """Smallest divisor th of H with th*W >= 256 (fills 256-deep MXU on v6e/v7x)
    and th*W % 8 == 0 whenever the row axis is actually tiled."""
    target = -(-256 // W)  # ceil(256 / W)
    for th in range(min(target, H), H + 1):
        if H % th == 0 and (th == H or (th * W) % 8 == 0):
            return th
    return H


# ----------------------------------------------------------------------------
# Conv2d(kernel=3, stride=1, padding=1) + ReLU
# In-kernel im2col: per dy, the three dx-shifted views are concatenated along
# channels (K = 3*Cin) and fed to one MXU matmul; f32 VMEM accumulator; fused
# bias + ReLU epilogue; flat lane store.
# ----------------------------------------------------------------------------
def _conv3x3_relu_kernel(x_ref, w_ref, b_ref, o_ref, acc_ref, *, th, W, Cin, Cout):
    # x_ref: (1, H+2, W+2, Cin) bf16 padded image, resident across the t axis
    # w_ref: (3, 3*Cin, Cout)   bf16 (dy, [dx|cin], cout)
    # b_ref: (1, Cout)          f32
    # o_ref: (1, th*W, Cout)    bf16 (flat row-tile)
    # acc_ref: (th*W, Cout)     f32 VMEM scratch
    t = pl.program_id(1)
    r0 = t * th
    for dy in range(3):
        rows = x_ref[0, pl.ds(r0 + dy, th), :, :]                   # (th, W+2, Cin)
        patch = jnp.concatenate(
            [rows[:, dx:dx + W, :] for dx in range(3)], axis=-1)    # (th, W, 3*Cin)
        patch = patch.reshape(th * W, 3 * Cin)
        part = jnp.dot(patch, w_ref[dy], preferred_element_type=jnp.float32)
        if dy == 0:
            acc_ref[...] = part
        else:
            acc_ref[...] += part
    y = jnp.maximum(acc_ref[...] + b_ref[...], 0.0)
    o_ref[0] = y.astype(o_ref.dtype)


def conv3x3_relu(x_nhwc, w_hwio, b):
    N, H, W, Cin = x_nhwc.shape
    Cout = w_hwio.shape[-1]
    th = _pick_conv_row_tile(H, W)
    nt = H // th
    Wp = W + 2

    xp = jnp.pad(x_nhwc, ((0, 0), (1, 1), (1, 1), (0, 0)))          # only zero-pad copy
    w_flat = w_hwio.reshape(3, 3 * Cin, Cout)                       # free reshape

    # TODO(synk): for Cout < 128 the store is still lane-sparse; a channel-padded
    # layout would make it lane-dense at the cost of 16x data at these tiny widths.
    out_flat = pl.pallas_call(
        functools.partial(_conv3x3_relu_kernel, th=th, W=W, Cin=Cin, Cout=Cout),
        out_shape=jax.ShapeDtypeStruct((N, H * W, Cout), jnp.bfloat16),
        grid=(N, nt),
        in_specs=[
            # Padded image stays resident in VMEM across the row-tile axis.
            pl.BlockSpec((1, H + 2, Wp, Cin), lambda n, t: (n, 0, 0, 0)),
            pl.BlockSpec((3, 3 * Cin, Cout), lambda n, t: (0, 0, 0)),
            pl.BlockSpec((1, Cout), lambda n, t: (0, 0)),
        ],
        out_specs=pl.BlockSpec((1, th * W, Cout), lambda n, t: (n, t, 0)),
        scratch_shapes=[pltpu.VMEM((th * W, Cout), jnp.float32)],
        compiler_params=pltpu.CompilerParams(
            dimension_semantics=("parallel", "arbitrary"),
            vmem_limit_bytes=_VMEM_LIMIT),
    )(xp, w_flat, b.reshape(1, Cout))
    return out_flat.reshape(N, H, W, Cout)


# ----------------------------------------------------------------------------
# MaxPool2d(kernel_size=3, stride=2): stride-2 subsampling done on register
# values with static slices + even/odd reshapes (no strided ref indexers, no
# f32 scratch). Tiled over output rows; input block resident per batch item.
# ----------------------------------------------------------------------------
def _maxpool3x3_s2_kernel(x_ref, o_ref, *, tho, W, Wo, C):
    # x_ref: (1, H, W, C) bf16 ; o_ref: (1, tho, Wo, C) bf16
    t = pl.program_id(1)
    rows = x_ref[0, pl.ds(2 * t * tho, 2 * tho + 1), :, :]          # (2*tho+1, W, C)
    # Row taps: even, odd, even-shifted via even/odd reshape of static slices.
    a = rows[0:2 * tho].reshape(tho, 2, W, C)
    bsl = rows[1:2 * tho + 1].reshape(tho, 2, W, C)
    r = jnp.maximum(jnp.maximum(a[:, 0], a[:, 1]), bsl[:, 1])       # (tho, W, C)
    # Column taps: same even/odd trick along W.
    c0 = r[:, 0:2 * Wo, :].reshape(tho, Wo, 2, C)
    c1 = r[:, 1:2 * Wo + 1, :].reshape(tho, Wo, 2, C)
    o = jnp.maximum(jnp.maximum(c0[:, :, 0], c0[:, :, 1]), c1[:, :, 1])
    o_ref[0] = o.astype(o_ref.dtype)


def maxpool3x3_s2(x_nhwc, *, tile_rows_target=8):
    N, H, W, C = x_nhwc.shape
    Ho = (H - 3) // 2 + 1
    Wo = (W - 3) // 2 + 1
    tho = _largest_divisor_le(Ho, tile_rows_target)
    nt = Ho // tho
    return pl.pallas_call(
        functools.partial(_maxpool3x3_s2_kernel, tho=tho, W=W, Wo=Wo, C=C),
        out_shape=jax.ShapeDtypeStruct((N, Ho, Wo, C), x_nhwc.dtype),
        grid=(N, nt),
        in_specs=[pl.BlockSpec((1, H, W, C), lambda n, t: (n, 0, 0, 0))],
        out_specs=pl.BlockSpec((1, tho, Wo, C), lambda n, t: (n, t, 0, 0)),
        compiler_params=pltpu.CompilerParams(
            dimension_semantics=("parallel", "arbitrary"),
            vmem_limit_bytes=_VMEM_LIMIT),
    )(x_nhwc)


# ----------------------------------------------------------------------------
# Linear (+ optional fused ReLU): (M, N, K)-tiled matmul, f32 accumulator,
# bias/ReLU epilogue gated on the last K step.
# ----------------------------------------------------------------------------
def _linear_kernel(x_ref, w_ref, b_ref, o_ref, acc_ref, *, apply_relu):
    k = pl.program_id(2)

    @pl.when(k == 0)
    def _():
        acc_ref[...] = jnp.zeros_like(acc_ref)

    acc_ref[...] += jnp.dot(x_ref[...], w_ref[...],
                            preferred_element_type=jnp.float32)

    @pl.when(k == pl.num_programs(2) - 1)
    def _():
        y = acc_ref[...] + b_ref[...]
        if apply_relu:
            y = jnp.maximum(y, 0.0)
        o_ref[...] = y.astype(o_ref.dtype)


def linear(x, w, b, *, apply_relu=False, out_dtype=None, tm=256, tn=256, tk=512):
    # x: (M, K) bf16, w: (K, Nout) bf16, b: (Nout,) f32
    M, K = x.shape
    Nout = w.shape[1]
    out_dtype = out_dtype or x.dtype
    tm = _largest_divisor_le(M, tm)
    tn = _largest_divisor_le(Nout, tn)
    tk = _largest_divisor_le(K, tk)
    grid = (M // tm, Nout // tn, K // tk)
    return pl.pallas_call(
        functools.partial(_linear_kernel, apply_relu=apply_relu),
        out_shape=jax.ShapeDtypeStruct((M, Nout), out_dtype),
        grid=grid,
        in_specs=[
            pl.BlockSpec((tm, tk), lambda i, j, k: (i, k)),
            pl.BlockSpec((tk, tn), lambda i, j, k: (k, j)),
            pl.BlockSpec((1, tn), lambda i, j, k: (0, j)),
        ],
        out_specs=pl.BlockSpec((tm, tn), lambda i, j, k: (i, j)),
        scratch_shapes=[pltpu.VMEM((tm, tn), jnp.float32)],
        compiler_params=pltpu.CompilerParams(
            dimension_semantics=("parallel", "parallel", "arbitrary"),
            vmem_limit_bytes=_VMEM_LIMIT),
    )(x, w, b.reshape(1, Nout))


# ----------------------------------------------------------------------------
# VGG parameter init + forward
# ----------------------------------------------------------------------------
def init_vgg_params(key, in_channels, num_classes, config, hw, hidden):
    keys = iter(jax.random.split(key, 64))
    feats = []
    cin, H, W = in_channels, hw, hw
    for f in config:
        if f == 'M':
            H = (H - 3) // 2 + 1
            W = (W - 3) // 2 + 1
        else:
            # PyTorch Conv2d weight is (Cout, Cin, 3, 3); store HWIO in bf16.
            w = jax.random.normal(next(keys), (f, cin, 3, 3), jnp.float32)
            w = w * (1.0 / (9.0 * cin) ** 0.5)
            b = jax.random.normal(next(keys), (f,), jnp.float32) * 0.01
            feats.append((jnp.transpose(w, (2, 3, 1, 0)).astype(jnp.bfloat16), b))
            cin = f
    C, Hf, Wf = cin, H, W

    def lin(din, dout):
        # PyTorch Linear weight is (out, in); store transposed (in, out).
        w = jax.random.normal(next(keys), (dout, din), jnp.float32) / (din ** 0.5)
        b = jax.random.normal(next(keys), (dout,), jnp.float32) * 0.01
        return w.T, b

    # NOTE: reference module uses (512*7*7 -> 4096 -> 4096 -> classes); dims are
    # scaled down for the small synthetic run, structure is identical.
    w1_t, b1 = lin(C * Hf * Wf, hidden)          # rows in torch (c, h, w) order
    # Fold the NCHW flatten permutation into fc1's rows (free at init).
    w1_nhwc = (w1_t.reshape(C, Hf, Wf, hidden)
               .transpose(1, 2, 0, 3)
               .reshape(Hf * Wf * C, hidden))
    w2, b2 = lin(hidden, hidden)
    w3, b3 = lin(hidden, num_classes)
    # Pad classifier output lanes to a multiple of 128 (dense vst); slice after.
    ncp = max(128, ((num_classes + 127) // 128) * 128)
    w3p = jnp.zeros((hidden, ncp), jnp.float32).at[:, :num_classes].set(w3)
    b3p = jnp.zeros((ncp,), jnp.float32).at[:num_classes].set(b3)

    return {
        'features': feats,
        'fc1': (w1_nhwc.astype(jnp.bfloat16), b1),
        'fc1_torch': (w1_t.astype(jnp.bfloat16), b1),       # reference only
        'fc2': (w2.astype(jnp.bfloat16), b2),
        'fc3': (w3p.astype(jnp.bfloat16), b3p),
        'fc3_unpadded': (w3.astype(jnp.bfloat16), b3),       # reference only
        'num_classes': num_classes,
    }


def vgg_forward(params, x_nchw, config):
    x = jnp.transpose(x_nchw, (0, 2, 3, 1)).astype(jnp.bfloat16)   # NCHW -> NHWC bf16
    li = 0
    for f in config:
        if f == 'M':
            x = maxpool3x3_s2(x)
        else:
            w, b = params['features'][li]
            x = conv3x3_relu(x, w, b)
            li += 1
    # torch.flatten(x, 1) semantics: NCHW permutation is folded into fc1's rows.
    x = x.reshape(x.shape[0], -1)
    w1, b1 = params['fc1']
    w2, b2 = params['fc2']
    w3, b3 = params['fc3']
    x = linear(x, w1, b1, apply_relu=True, out_dtype=jnp.bfloat16)
    # TODO(synk): nn.Dropout() treated as inference-mode identity (no stochastic mask).
    x = linear(x, w2, b2, apply_relu=True, out_dtype=jnp.bfloat16)
    x = linear(x, w3, b3, apply_relu=False, out_dtype=jnp.float32)
    return x[:, :params['num_classes']]


# ----------------------------------------------------------------------------
# Pure-JAX reference (same bf16-in / f32-accumulate policy; torch flatten order)
# ----------------------------------------------------------------------------
def vgg_reference(params, x_nchw, config):
    x = jnp.transpose(x_nchw, (0, 2, 3, 1)).astype(jnp.bfloat16)
    li = 0
    for f in config:
        if f == 'M':
            x = lax.reduce_window(x, jnp.array(-jnp.inf, x.dtype), lax.max,
                                  (1, 3, 3, 1), (1, 2, 2, 1), 'VALID')
        else:
            w, b = params['features'][li]
            y = lax.conv_general_dilated(
                x, w, (1, 1), ((1, 1), (1, 1)),
                dimension_numbers=('NHWC', 'HWIO', 'NHWC'),
                preferred_element_type=jnp.float32)
            x = jnp.maximum(y + b, 0.0).astype(jnp.bfloat16)
            li += 1
    x = jnp.transpose(x, (0, 3, 1, 2)).reshape(x.shape[0], -1)   # torch flatten (NCHW)
    w1, b1 = params['fc1_torch']
    w2, b2 = params['fc2']
    w3, b3 = params['fc3_unpadded']
    h = jnp.maximum(jnp.dot(x, w1, preferred_element_type=jnp.float32) + b1, 0.0)
    h = h.astype(jnp.bfloat16)
    h = jnp.maximum(jnp.dot(h, w2, preferred_element_type=jnp.float32) + b2, 0.0)
    h = h.astype(jnp.bfloat16)
    return jnp.dot(h, w3, preferred_element_type=jnp.float32) + b3


if __name__ == "__main__":
    key = jax.random.PRNGKey(0)
    in_channels, num_classes = 4, 10
    config = [8, 'M', 16, 'M']     # small VGG-style config: conv-pool-conv-pool
    N, HW = 2, 16
    hidden = 256                   # scaled-down stand-in for the 4096-wide FC layers

    kp, kx = jax.random.split(key)
    params = init_vgg_params(kp, in_channels, num_classes, config, HW, hidden)
    x = jax.random.normal(kx, (N, in_channels, HW, HW), jnp.float32)   # NCHW input

    out = jax.block_until_ready(vgg_forward(params, x, config))
    ref = jax.block_until_ready(vgg_reference(params, x, config))

    assert out.shape == (N, num_classes), out.shape
    assert bool(jnp.all(jnp.isfinite(out)))
    assert jnp.allclose(out, ref, rtol=2e-2, atol=2e-2), (
        float(jnp.max(jnp.abs(out - ref))))
    print("KERNEL_OK")
</pallas_src>

<mosaic_0001>
module attributes {stable_mosaic.version = 11 : i64} {
  func.func @_conv3x3_relu_kernel(%arg0: i32, %arg1: i32, %arg2: memref<1x18x18x4xbf16, #tpu.memory_space<vmem>>, %arg3: memref<3x12x8xbf16, #tpu.memory_space<vmem>>, %arg4: memref<1x8xf32, #tpu.memory_space<vmem>>, %arg5: memref<1x256x8xbf16, #tpu.memory_space<vmem>>, %arg6: memref<256x8xf32, #tpu.memory_space<vmem>>) attributes {dimension_semantics = [#tpu.dimension_semantics<parallel>, #tpu.dimension_semantics<arbitrary>], iteration_bounds = array<i64: 2, 1>, scalar_prefetch = 0 : i64, scratch_operands = 1 : i64, tpu.core_type = #tpu.core_type<tc>, window_params = [{transform_indices = @transform_0, window_bounds = array<i64: 1, 18, 18, 4>}, {pipeline_mode = #tpu.pipeline_mode<synchronous>, transform_indices = @transform_1, window_bounds = array<i64: 3, 12, 8>}, {pipeline_mode = #tpu.pipeline_mode<synchronous>, transform_indices = @transform_2, window_bounds = array<i64: 1, 8>}, {transform_indices = @transform_3, window_bounds = array<i64: 1, 256, 8>}]} {
    %c16_i32 = arith.constant 16 : i32
    %0 = arith.muli %arg1, %c16_i32 : i32
    %c0_i32 = arith.constant 0 : i32
    %1 = arith.addi %0, %c0_i32 : i32
    %c0 = arith.constant 0 : index
    %2 = arith.index_cast %1 : i32 to index
    %c0_0 = arith.constant 0 : index
    %c0_1 = arith.constant 0 : index
    %3 = vector.load %arg2[%c0, %2, %c0_0, %c0_1] : memref<1x18x18x4xbf16, #tpu.memory_space<vmem>>, vector<1x16x18x4xbf16>
    %4 = vector.shape_cast %3 : vector<1x16x18x4xbf16> to vector<16x18x4xbf16>
    %5 = vector.extract_strided_slice %4 {offsets = [0, 0, 0], sizes = [16, 16, 4], strides = [1, 1, 1]} : vector<16x18x4xbf16> to vector<16x16x4xbf16>
    %6 = vector.extract_strided_slice %4 {offsets = [0, 1, 0], sizes = [16, 16, 4], strides = [1, 1, 1]} : vector<16x18x4xbf16> to vector<16x16x4xbf16>
    %7 = vector.extract_strided_slice %4 {offsets = [0, 2, 0], sizes = [16, 16, 4], strides = [1, 1, 1]} : vector<16x18x4xbf16> to vector<16x16x4xbf16>
    %8 = tpu.concatenate %5, %6, %7 in 2 : vector<16x16x4xbf16>, vector<16x16x4xbf16>, vector<16x16x4xbf16> -> vector<16x16x12xbf16>
    %9 = vector.shape_cast %8 : vector<16x16x12xbf16> to vector<256x12xbf16>
    %c0_2 = arith.constant 0 : index
    %c0_3 = arith.constant 0 : index
    %c0_4 = arith.constant 0 : index
    %10 = vector.load %arg3[%c0_2, %c0_3, %c0_4] : memref<3x12x8xbf16, #tpu.memory_space<vmem>>, vector<1x12x8xbf16>
    %11 = vector.shape_cast %10 : vector<1x12x8xbf16> to vector<12x8xbf16>
    %cst = arith.constant dense<0.000000e+00> : vector<256x8xf32>
    %12 = tpu.matmul %9, %11, %cst {dimension_numbers = #tpu.dot_dimension_numbers<[1], [0], [0], [1], [0, 0, 1, 1], [], []>} : vector<256x12xbf16>, vector<12x8xbf16>, vector<256x8xf32> -> vector<256x8xf32>
    %c0_5 = arith.constant 0 : index
    %c0_6 = arith.constant 0 : index
    %13 = vector.load %arg6[%c0_5, %c0_6] : memref<256x8xf32, #tpu.memory_space<vmem>>, vector<256x8xf32>
    tpu.vector_store %arg6[%c0_5, %c0_6], %12 {strides = array<i32>} : memref<256x8xf32, #tpu.memory_space<vmem>>, vector<256x8xf32>,
    %c1_i32 = arith.constant 1 : i32
    %14 = arith.addi %0, %c1_i32 : i32
    %c0_7 = arith.constant 0 : index
    %15 = arith.index_cast %14 : i32 to index
    %c0_8 = arith.constant 0 : index
    %c0_9 = arith.constant 0 : index
    %16 = vector.load %arg2[%c0_7, %15, %c0_8, %c0_9] : memref<1x18x18x4xbf16, #tpu.memory_space<vmem>>, vector<1x16x18x4xbf16>
    %17 = vector.shape_cast %16 : vector<1x16x18x4xbf16> to vector<16x18x4xbf16>
    %18 = vector.extract_strided_slice %17 {offsets = [0, 0, 0], sizes = [16, 16, 4], strides = [1, 1, 1]} : vector<16x18x4xbf16> to vector<16x16x4xbf16>
    %19 = vector.extract_strided_slice %17 {offsets = [0, 1, 0], sizes = [16, 16, 4], strides = [1, 1, 1]} : vector<16x18x4xbf16> to vector<16x16x4xbf16>
    %20 = vector.extract_strided_slice %17 {offsets = [0, 2, 0], sizes = [16, 16, 4], strides = [1, 1, 1]} : vector<16x18x4xbf16> to vector<16x16x4xbf16>
    %21 = tpu.concatenate %18, %19, %20 in 2 : vector<16x16x4xbf16>, vector<16x16x4xbf16>, vector<16x16x4xbf16> -> vector<16x16x12xbf16>
    %22 = vector.shape_cast %21 : vector<16x16x12xbf16> to vector<256x12xbf16>
    %c1 = arith.constant 1 : index
    %c0_10 = arith.constant 0 : index
    %c0_11 = arith.constant 0 : index
    %23 = vector.load %arg3[%c1, %c0_10, %c0_11] : memref<3x12x8xbf16, #tpu.memory_space<vmem>>, vector<1x12x8xbf16>
    %24 = vector.shape_cast %23 : vector<1x12x8xbf16> to vector<12x8xbf16>
    %cst_12 = arith.constant dense<0.000000e+00> : vector<256x8xf32>
    %25 = tpu.matmul %22, %24, %cst_12 {dimension_numbers = #tpu.dot_dimension_numbers<[1], [0], [0], [1], [0, 0, 1, 1], [], []>} : vector<256x12xbf16>, vector<12x8xbf16>, vector<256x8xf32> -> vector<256x8xf32>
    %c0_13 = arith.constant 0 : index
    %c0_14 = arith.constant 0 : index
    %26 = vector.load %arg6[%c0_13, %c0_14] : memref<256x8xf32, #tpu.memory_space<vmem>>, vector<256x8xf32>
    %27 = arith.addf %26, %25 : vector<256x8xf32>
    %c0_15 = arith.constant 0 : index
    %c0_16 = arith.constant 0 : index
    %28 = vector.load %arg6[%c0_15, %c0_16] : memref<256x8xf32, #tpu.memory_space<vmem>>, vector<256x8xf32>
    tpu.vector_store %arg6[%c0_15, %c0_16], %27 {strides = array<i32>} : memref<256x8xf32, #tpu.memory_space<vmem>>, vector<256x8xf32>,
    %c2_i32 = arith.constant 2 : i32
    %29 = arith.addi %0, %c2_i32 : i32
    %c0_17 = arith.constant 0 : index
    %30 = arith.index_cast %29 : i32 to index
    %c0_18 = arith.constant 0 : index
    %c0_19 = arith.constant 0 : index
    %31 = vector.load %arg2[%c0_17, %30, %c0_18, %c0_19] : memref<1x18x18x4xbf16, #tpu.memory_space<vmem>>, vector<1x16x18x4xbf16>
    %32 = vector.shape_cast %31 : vector<1x16x18x4xbf16> to vector<16x18x4xbf16>
    %33 = vector.extract_strided_slice %32 {offsets = [0, 0, 0], sizes = [16, 16, 4], strides = [1, 1, 1]} : vector<16x18x4xbf16> to vector<16x16x4xbf16>
    %34 = vector.extract_strided_slice %32 {offsets = [0, 1, 0], sizes = [16, 16, 4], strides = [1, 1, 1]} : vector<16x18x4xbf16> to vector<16x16x4xbf16>
    %35 = vector.extract_strided_slice %32 {offsets = [0, 2, 0], sizes = [16, 16, 4], strides = [1, 1, 1]} : vector<16x18x4xbf16> to vector<16x16x4xbf16>
    %36 = tpu.concatenate %33, %34, %35 in 2 : vector<16x16x4xbf16>, vector<16x16x4xbf16>, vector<16x16x4xbf16> -> vector<16x16x12xbf16>
    %37 = vector.shape_cast %36 : vector<16x16x12xbf16> to vector<256x12xbf16>
    %c2 = arith.constant 2 : index
    %c0_20 = arith.constant 0 : index
    %c0_21 = arith.constant 0 : index
    %38 = vector.load %arg3[%c2, %c0_20, %c0_21] : memref<3x12x8xbf16, #tpu.memory_space<vmem>>, vector<1x12x8xbf16>
    %39 = vector.shape_cast %38 : vector<1x12x8xbf16> to vector<12x8xbf16>
    %cst_22 = arith.constant dense<0.000000e+00> : vector<256x8xf32>
    %40 = tpu.matmul %37, %39, %cst_22 {dimension_numbers = #tpu.dot_dimension_numbers<[1], [0], [0], [1], [0, 0, 1, 1], [], []>} : vector<256x12xbf16>, vector<12x8xbf16>, vector<256x8xf32> -> vector<256x8xf32>
    %c0_23 = arith.constant 0 : index
    %c0_24 = arith.constant 0 : index
    %41 = vector.load %arg6[%c0_23, %c0_24] : memref<256x8xf32, #tpu.memory_space<vmem>>, vector<256x8xf32>
    %42 = arith.addf %41, %40 : vector<256x8xf32>
    %c0_25 = arith.constant 0 : index
    %c0_26 = arith.constant 0 : index
    %43 = vector.load %arg6[%c0_25, %c0_26] : memref<256x8xf32, #tpu.memory_space<vmem>>, vector<256x8xf32>
    tpu.vector_store %arg6[%c0_25, %c0_26], %42 {strides = array<i32>} : memref<256x8xf32, #tpu.memory_space<vmem>>, vector<256x8xf32>,
    %c0_27 = arith.constant 0 : index
    %c0_28 = arith.constant 0 : index
    %44 = vector.load %arg6[%c0_27, %c0_28] : memref<256x8xf32, #tpu.memory_space<vmem>>, vector<256x8xf32>
    %c0_29 = arith.constant 0 : index
    %c0_30 = arith.constant 0 : index
    %45 = vector.load %arg4[%c0_29, %c0_30] : memref<1x8xf32, #tpu.memory_space<vmem>>, vector<1x8xf32>
    %46 = vector.broadcast %45 : vector<1x8xf32> to vector<256x8xf32>
    %47 = arith.addf %44, %46 : vector<256x8xf32>
    %cst_31 = arith.constant 0.000000e+00 : f32
    %48 = vector.broadcast %cst_31 : f32 to vector<256x8xf32>
    %49 = arith.maximumf %47, %48 : vector<256x8xf32>
    %50 = arith.truncf %49 : vector<256x8xf32> to vector<256x8xbf16>
    %c0_32 = arith.constant 0 : index
    %c0_33 = arith.constant 0 : index
    %c0_34 = arith.constant 0 : index
    %51 = vector.load %arg5[%c0_32, %c0_33, %c0_34] : memref<1x256x8xbf16, #tpu.memory_space<vmem>>, vector<1x256x8xbf16>
    %52 = vector.shape_cast %51 : vector<1x256x8xbf16> to vector<256x8xbf16>
    %53 = vector.shape_cast %50 : vector<256x8xbf16> to vector<1x256x8xbf16>
    tpu.vector_store %arg5[%c0_32, %c0_33, %c0_34], %53 {strides = array<i32>} : memref<1x256x8xbf16, #tpu.memory_space<vmem>>, vector<1x256x8xbf16>,
    return
  }
  func.func @transform_0(%arg0: i32, %arg1: i32) -> (i32, i32, i32, i32) {
    %c0_i32 = arith.constant 0 : i32
    %c0_i32_0 = arith.constant 0 : i32
    %c0_i32_1 = arith.constant 0 : i32
    %c0_i32_2 = arith.constant 0 : i32
    return %arg0, %c0_i32, %c0_i32_0, %c0_i32_1 : i32, i32, i32, i32
  }
  func.func @transform_1(%arg0: i32, %arg1: i32) -> (i32, i32, i32) {
    %c0_i32 = arith.constant 0 : i32
    %c0_i32_0 = arith.constant 0 : i32
    %c0_i32_1 = arith.constant 0 : i32
    %c0_i32_2 = arith.constant 0 : i32
    return %c0_i32, %c0_i32_0, %c0_i32_1 : i32, i32, i32
  }
  func.func @transform_2(%arg0: i32, %arg1: i32) -> (i32, i32) {
    %c0_i32 = arith.constant 0 : i32
    %c0_i32_0 = arith.constant 0 : i32
    %c0_i32_1 = arith.constant 0 : i32
    return %c0_i32, %c0_i32_0 : i32, i32
  }
  func.func @transform_3(%arg0: i32, %arg1: i32) -> (i32, i32, i32) {
    %c0_i32 = arith.constant 0 : i32
    %c0_i32_0 = arith.constant 0 : i32
    return %arg0, %arg1, %c0_i32 : i32, i32, i32
  }
}

</mosaic_0001>

<bundles_post_ra>
// kernel: tpu_custom_call.1
= control target key start
LH: loop header
LB: loop body
LE: loop exit
PB: predicated region body
PF: predicated region fallthrough
CT: control target
= control target key end

     0   :  { %s3221_s12 = smov 0   ;;  %s3223_s13 = smov 0   ;;  %s4322_s0 = inlined_call_operand.vmem [shape: bf16[2,18,18,4], index: 0, kind: input, shape index: {}]   ;;  %s4323_s1 = inlined_call_operand.vmem [shape: bf16[3,12,8], index: 1, kind: input, shape index: {}]   ;;  %s4324_s2 = inlined_call_operand.vmem [shape: f32[1,8], index: 2, kind: input, shape index: {}]   ;;  %s4325_s3 = inlined_call_operand.vmem [shape: bf16[2,256,8], index: 3, kind: output, shape index: {}]  }
   0x1   :  { %s3225_s14 = smov 0  }
   0x2 LB: > { %s25_s15 = sadd.s32 1, %s3193_s13  ;;  %p2724_p0 = scmp.ge.s32.totalorder %s3197_s14, 1  ;;  %s3197_s14 = sphi %s3225_s14, %s13_s14   ;;  %s3193_s13 = sphi %s3223_s13, %s4327_s13   ;;  %s3189_s12 = sphi %s3221_s12, %s4326_s12  }
   0x3   : > { %p27_p1 = scmp.ge.s32.totalorder %s25_s15, 2  ;;  %p151_p2 = scmp.lt.s32.totalorder %s3197_s14, 3 }
   0x5   : > { %s4329_s15 = smov (%p27_p1, %s25_s15), 0  ;;  %p152_p3 = pnand %p2724_p0, %p151_p2 }
   0x6   : > { %p179_p4 = scmp.lt.s32.totalorder (!%p152_p3), %s3189_s12, 1  ;;  %s3199_s20 = smov (!%p152_p3), 8  }
   0x7   : > { %155 = sbr.rel (%p152_p3) target bundleno = 547 (0x223), region = 32  ;;  %s3200_s21 = smov (!%p152_p3), 4  }
   0xc   : > { %s4331_s12 = smov (!%p179_p4, %s3189_s12), 1  ;;  %vm600_vm0 = vcmask 1046528   ;;  %vm375_vm1 = vsmask.f32 7424  ;;  %vm787_vm2 = vcmask 1045504   ;;  %vm681_vm3 = vcmask 31744  }
   0xd   : > { %s3137_s16 = smul.u32 216, %s4331_s12  ;;  %vm714_vm4 = vcmask 64512   ;;  %vm754_vm5 = vcmask 97280   ;;  %s3082_s9 = sshll.u32 %s4331_s12, 7  ;;  %vm2596_vm6 = vcmask 60416  }
   0xf   : > { %s3245_s19 = scalar_lea.vmem %s4322_s0, %s3137_s16  ;;  %s4071_s16 = scalar_lea.vmem %s4325_s3, %s3082_s9 }
  0x10   : > { %v3248_v0 = vld [vmem:[%s3245_s19 + $0xc] sm:$0xff]  ;;  %v2814_v1 = vld [vmem:[%s3245_s19 + $0x14] sm:$0x1]  ;;  %v3252_v2 = vld [vmem:[%s3245_s19] sm:$0xff] }
  0x11   : > { %v1060_v3 = vunpack.c.l.b16 %v2814_v1  ;;  %v201_v4 = vld [vmem:[%s3245_s19 + $0x8] sm:$0x1]  ;;  %v2948_v5 = vld [vmem:[%s3245_s19 + $0x20] sm:$0x1]  ;;  %v237_v8 = vld [vmem:[%s3245_s19 + $0x98] sm:$0x1] }
  0x12   : > { %v343_v6 = vunpack.c.l.b16 %v201_v4  ;;  %v1836_v7 = vunpack.c.l.b16 %v2948_v5  ;;  %v1316_v10 = vrot.slane %v3248_v0, 1  ;;  %v355_v11 = vunpack.c.l.b16 %v237_v8  ;;  %v3260_v14 = vld [vmem:[%s3245_s19 + $0x18] sm:$0xff]  ;;  %v3263_v18 = vld [vmem:[%s3245_s19 + $0x90] sm:$0xff]  ;;  %v2817_v31 = vld [vmem:[%s3245_s19 + $0x20] sm:$0x1] }
  0x13   : > { %v1076_v9 = vpack.c.b16 %v1060_v3, %v1060_v3  ;;  %v601_v13 = vrot.slane %v3252_v2, 1  ;;  %v2092_v22 = vrot.slane %v3260_v14, 1  ;;  %v1095_v23 = vshll.u32 %v3248_v0, 16  ;;  %v3280_v42 = vld [vmem:[%s3245_s19 + $0x18] sm:$0xff]  ;;  %v204_v49 = vld [vmem:[%s3245_s19 + $0x14] sm:$0x1] }
  0x14   : > { %v359_v12 = vpack.c.b16 %v343_v6, %v343_v6  ;;  %v1852_v16 = vpack.c.b16 %v1836_v7, %v1836_v7  ;;  %v371_v19 = vpack.c.b16 %v355_v11, %v355_v11  ;;  %v379_v25 = vshll.u32 %v3252_v2, 16  ;;  %v2951_v56 = vld [vmem:[%s3245_s19 + $0x2c] sm:$0x1]  ;;  %v240_v61 = vld [vmem:[%s3245_s19 + $0xa4] sm:$0x1] }
  0x15   : > { %v1317_v15 = vrot.slane %v1076_v9, 1  ;;  %v521_v26 = vshrl.u32 %v3263_v18, 16  ;;  %v523_v27 = vshll.u32 %v3263_v18, 16  ;;  %v637_v28 = vrot.slane %v3263_v18, 1  ;;  %v3297_v63 = vld [vmem:[%s3245_s19 + $0xc] sm:$0xff]  ;;  %v3303_v7 = vld [vmem:[%s3245_s19 + $0x24] sm:$0xff] }
  0x16   : > { %v602_v17 = vrot.slane %v359_v12, 1  ;;  %v2093_v24 = vrot.slane %v1852_v16, 1  ;;  %v638_v29 = vrot.slane %v371_v19, 1  ;;  %v528_v30 = vshll.u32 %v371_v19, 16 }
  0x17   : > { %v1318_v20 = vsel %vm600_vm0, %v1316_v10, %v1317_v15  ;;  %v1093_v32 = vshrl.u32 %v3248_v0, 16  ;;  %v1100_v33 = vshll.u32 %v1076_v9, 16  ;;  %v525_v34 = vrot.slane %v523_v27, 1  ;;  %v3307_v10 = vld [vmem:[%s3245_s19 + $0x9c] sm:$0xff] }
  0x18   : > { %1364 = vrot.lane.b32.xlu1 %v1318_v20, %s3199_s20  ;;  %v603_v21 = vsel %vm600_vm0, %v601_v13, %v602_v17  ;;  %v1097_v35 = vrot.slane %v1095_v23, 1  ;;  %v377_v36 = vshrl.u32 %v3252_v2, 16  ;;  %v384_v37 = vshll.u32 %v359_v12, 16 }
  0x19   : > { %649 = vrot.lane.b32.xlu0 %v603_v21, %s3199_s20  ;;  %v530_v38 = vrot.slane %v528_v30, 1  ;;  %v2094_v39 = vsel %vm600_vm0, %v2092_v22, %v2093_v24  ;;  %v381_v40 = vrot.slane %v379_v25, 1  ;;  %v526_v41 = vor.u32 %v525_v34, %v521_v26  ;;  %v207_v26 = vld [vmem:[%s3245_s19 + $0x20] sm:$0x1] }
  0x1a   : > { %v1061_v43 = vunpack.c.l.b16 %v2817_v31  ;;  %v639_v44 = vsel %vm600_vm0, %v637_v28, %v638_v29  ;;  %v1869_v45 = vshrl.u32 %v3260_v14, 16  ;;  %v1871_v46 = vshll.u32 %v3260_v14, 16  ;;  %v3320_v31 = vld [vmem:[%s3245_s19 + $0x18] sm:$0xff] }
  0x1b   : > { %v1876_v47 = vshll.u32 %v1852_v16, 16  ;;  %v531_v48 = vsel %vm375_vm1, %v526_v41, %v530_v38  ;;  %v1098_v50 = vor.u32 %v1097_v35, %v1093_v32  ;;  %v1102_v51 = vrot.slane %v1100_v33, 1 }
  0x1c   : > { %592 = vrot.lane.b32.xlu2 %v531_v48, %s3200_s21  ;;  %v1873_v52 = vrot.slane %v1871_v46, 1  ;;  %v3290_v53 = vpack.c.b16 %v1061_v43, %v1061_v43  ;;  %v1107_v54 = vshll.u32 %v3280_v42, 16  ;;  %v382_v57 = vor.u32 %v381_v40, %v377_v36 }
  0x1d   : > { %v1878_v55 = vrot.slane %v1876_v47, 1  ;;  %v386_v58 = vrot.slane %v384_v37, 1  ;;  %v344_v59 = vunpack.c.l.b16 %v204_v49  ;;  %v1103_v62 = vsel %vm375_vm1, %v1098_v50, %v1102_v51  ;;  %v2820_v49 = vld [vmem:[%s3245_s19 + $0x2c] sm:$0x1] }
  0x1e   : > { %v1874_v60 = vor.u32 %v1873_v52, %v1869_v45  ;;  %v1837_v1 = vunpack.c.l.b16 %v2951_v56  ;;  %v1105_v3 = vshrl.u32 %v3280_v42, 16  ;;  %v1109_v4 = vrot.slane %v1107_v54, 1 }
  0x1f   : > { %v1112_v5 = vshll.u32 %v3290_v53, 16  ;;  %v387_v8 = vsel %vm375_vm1, %v382_v57, %v386_v58  ;;  %v360_v9 = vpack.c.b16 %v344_v59, %v344_v59  ;;  %v356_v11 = vunpack.c.l.b16 %v240_v61  ;;  %v3338_v57 = vld [vmem:[%s3245_s19 + $0x24] sm:$0xff] }
  0x20   : > { %2140 = vrot.lane.b32.xlu1 %v2094_v39, %s3199_s20  ;;  %v1879_v6 = vsel %vm375_vm1, %v1874_v60, %v1878_v55  ;;  %v389_v12 = vshrl.u32 %v3297_v63, 16  ;;  %v391_v13 = vshll.u32 %v3297_v63, 16  ;;  %v604_v15 = vrot.slane %v3297_v63, 1 }
  0x21   : > { %673 = vrot.lane.b32.xlu0 %v639_v44, %s3199_s20  ;;  %v1853_v16 = vpack.c.b16 %v1837_v1, %v1837_v1  ;;  %v396_v17 = vshll.u32 %v360_v9, 16  ;;  %v1110_v19 = vor.u32 %v1109_v4, %v1105_v3  ;;  %v1114_v20 = vrot.slane %v1112_v5, 1  ;;  %v2954_v5 = vld [vmem:[%s3245_s19 + $0x38] sm:$0x1] }
  0x22   : > { %v1883_v21 = vshll.u32 %v3303_v7, 16  ;;  %v393_v22 = vrot.slane %v391_v13, 1  ;;  %v605_v23 = vrot.slane %v360_v9, 1  ;;  %v372_v24 = vpack.c.b16 %v356_v11, %v356_v11 }
  0x23   : > { %v535_v25 = vshll.u32 %v3307_v10, 16  ;;  %v398_v27 = vrot.slane %v396_v17, 1  ;;  %v1881_v29 = vshrl.u32 %v3303_v7, 16  ;;  %v1888_v30 = vshll.u32 %v1853_v16, 16 }
  0x24   : > { %2060 = vrot.lane.b32.xlu2 %v1879_v6, %s3200_s21  ;;  %v394_v28 = vor.u32 %v393_v22, %v389_v12  ;;  %v1115_v32 = vsel %vm375_vm1, %v1110_v19, %v1114_v20  ;;  %v1885_v33 = vrot.slane %v1883_v21, 1  ;;  %v345_v34 = vunpack.c.l.b16 %v207_v26  ;;  %v243_v6 = vld [vmem:[%s3245_s19 + $0xb0] sm:$0x1]  ;;  %v3356_v19 = vld [vmem:[%s3245_s19 + $0xa8] sm:$0xff] }
  0x25   : > { %v606_v36 = vsel %vm600_vm0, %v604_v15, %v605_v23  ;;  %v533_v37 = vshrl.u32 %v3307_v10, 16  ;;  %v537_v38 = vrot.slane %v535_v25, 1  ;;  %v540_v39 = vshll.u32 %v372_v24, 16 }
  0x26   : > { %v399_v35 = vsel %vm375_vm1, %v394_v28, %v398_v27  ;;  %v1890_v40 = vrot.slane %v1888_v30, 1  ;;  %v403_v41 = vshll.u32 %v3320_v31, 16  ;;  %v1886_v43 = vor.u32 %v1885_v33, %v1881_v29 }
  0x27   : > { %v361_v44 = vpack.c.b16 %v345_v34, %v345_v34  ;;  %v1319_v45 = vrot.slane %v3280_v42, 1  ;;  %v1320_v46 = vrot.slane %v3290_v53, 1  ;;  %v538_v47 = vor.u32 %v537_v38, %v533_v37 }
  0x28   : > { %1284 = vrot.lane.b32.xlu1 %v1103_v62, %s3200_s21  ;;  %v542_v48 = vrot.slane %v540_v39, 1  ;;  %v401_v50 = vshrl.u32 %v3320_v31, 16  ;;  %v1891_v51 = vsel %vm375_vm1, %v1886_v43, %v1890_v40  ;;  %v405_v52 = vrot.slane %v403_v41, 1  ;;  %v3372_v43 = vld [vmem:[%s3245_s19 + $0x24] sm:$0xff] }
  0x29   : > { %568 = vrot.lane.b32.xlu0 %v387_v8, %s3200_s21  ;;  %v408_v54 = vshll.u32 %v361_v44, 16  ;;  %v1321_v55 = vsel %vm600_vm0, %v1319_v45, %v1320_v46  ;;  %v1062_v58 = vunpack.c.l.b16 %v2820_v49  ;;  %v2095_v53 = vrot.slane %v3303_v7, 1 }
  0x2a   : > { %v543_v56 = vsel %vm375_vm1, %v538_v47, %v542_v48  ;;  %v2096_v59 = vrot.slane %v1853_v16, 1  ;;  %v406_v60 = vor.u32 %v405_v52, %v401_v50  ;;  %v640_v62 = vrot.slane %v3307_v10, 1  ;;  %v3353_v16 = vld [vmem:[%s3245_s19 + $0x30] sm:$0xff]  ;;  %v246_v47 = vld [vmem:[%s3245_s19 + $0xbc] sm:$0x1] }
  0x2b   : > { %v410_v61 = vrot.slane %v408_v54, 1  ;;  %v641_v1 = vrot.slane %v372_v24, 1  ;;  %v1078_v3 = vpack.c.b16 %v1062_v58, %v1062_v58  ;;  %v1119_v4 = vshll.u32 %v3338_v57, 16  ;;  %v2823_v58 = vld [vmem:[%s3245_s19 + $0x38] sm:$0x1] }
  0x2c   : > { %570 = vrot.lane.b32.xlu2 %v399_v35, %s3200_s21  ;;  %v2097_v9 = vsel %vm600_vm0, %v2095_v53, %v2096_v59  ;;  %v1117_v12 = vshrl.u32 %v3338_v57, 16  ;;  %v1838_v17 = vunpack.c.l.b16 %v2954_v5  ;;  %v357_v20 = vunpack.c.l.b16 %v243_v6 }
  0x2d   : > { %v411_v8 = vsel %vm375_vm1, %v406_v60, %v410_v61  ;;  %v642_v11 = vsel %vm600_vm0, %v640_v62, %v641_v1  ;;  %v1121_v13 = vrot.slane %v1119_v4, 1  ;;  %v1124_v15 = vshll.u32 %v1078_v3, 16 }
  0x2e   : > { %v1322_v21 = vrot.slane %v3338_v57, 1  ;;  %v1323_v22 = vrot.slane %v1078_v3, 1  ;;  %v607_v23 = vrot.slane %v3320_v31, 1  ;;  %v608_v24 = vrot.slane %v361_v44, 1  ;;  %v3389_v3 = vld [vmem:[%s3245_s19 + $0x30] sm:$0xff] }
  0x2f   : > { %v547_v25 = vshll.u32 %v3356_v19, 16  ;;  %v1122_v26 = vor.u32 %v1121_v13, %v1117_v12  ;;  %v1126_v27 = vrot.slane %v1124_v15, 1  ;;  %v1854_v28 = vpack.c.b16 %v1838_v17, %v1838_v17 }
  0x30   : > { %1286 = vrot.lane.b32.xlu1 %v1115_v32, %s3200_s21  ;;  %v1895_v29 = vshll.u32 %v3353_v16, 16  ;;  %v373_v30 = vpack.c.b16 %v357_v20, %v357_v20  ;;  %v210_v32 = vld [vmem:[%s3245_s19 + $0x2c] sm:$0x1]  ;;  %v1324_v33 = vsel %vm600_vm0, %v1322_v21, %v1323_v22  ;;  %v1893_v34 = vshrl.u32 %v3353_v16, 16 }
  0x31   : > { %651 = vrot.lane.b32.xlu0 %v606_v36, %s3199_s20  ;;  %v609_v35 = vsel %vm600_vm0, %v607_v23, %v608_v24  ;;  %v545_v36 = vshrl.u32 %v3356_v19, 16  ;;  %v549_v37 = vrot.slane %v547_v25, 1  ;;  %v1127_v39 = vsel %vm375_vm1, %v1122_v26, %v1126_v27  ;;  %v2957_v25 = vld [vmem:[%s3245_s19 + $0x44] sm:$0x1] }
  0x32   : > { %v552_v38 = vshll.u32 %v373_v30, 16  ;;  %v1897_v40 = vrot.slane %v1895_v29, 1  ;;  %v1900_v41 = vshll.u32 %v1854_v28, 16  ;;  %v346_v44 = vunpack.c.l.b16 %v210_v32  ;;  %v3408_v32 = vld [vmem:[%s3245_s19 + $0x3c] sm:$0xff] }
  0x33   : > { %v643_v45 = vrot.slane %v3356_v19, 1  ;;  %v644_v46 = vrot.slane %v373_v30, 1  ;;  %v550_v48 = vor.u32 %v549_v37, %v545_v36  ;;  %v415_v54 = vshll.u32 %v3372_v43, 16  ;;  %v2826_v36 = vld [vmem:[%s3245_s19 + $0x44] sm:$0x1] }
  0x34   : > { %1366 = vrot.lane.b32.xlu2 %v1321_v55, %s3199_s20  ;;  %v554_v49 = vrot.slane %v552_v38, 1  ;;  %v1898_v50 = vor.u32 %v1897_v40, %v1893_v34  ;;  %v362_v52 = vpack.c.b16 %v346_v44, %v346_v44  ;;  %v3381_v55 = vld [vmem:[%s3245_s19 + $0xb4] sm:$0xff]  ;;  %v413_v61 = vshrl.u32 %v3372_v43, 16 }
  0x35   : > { %v645_v53 = vsel %vm600_vm0, %v643_v45, %v644_v46  ;;  %v417_v62 = vrot.slane %v415_v54, 1  ;;  %v1063_v4 = vunpack.c.l.b16 %v2823_v58  ;;  %v610_v5 = vrot.slane %v3372_v43, 1  ;;  %v3418_v46 = vld [vmem:[%s3245_s19 + $0x3c] sm:$0xff] }
  0x36   : > { %v555_v59 = vsel %vm375_vm1, %v550_v48, %v554_v49  ;;  %v420_v1 = vshll.u32 %v362_v52, 16  ;;  %v611_v6 = vrot.slane %v362_v52, 1  ;;  %v2099_v12 = vrot.slane %v1854_v28, 1  ;;  %v213_v48 = vld [vmem:[%s3245_s19 + $0x38] sm:$0x1] }
  0x37   : > { %v1131_v13 = vshll.u32 %v3389_v3, 16  ;;  %v418_v15 = vor.u32 %v417_v62, %v413_v61  ;;  %v1079_v20 = vpack.c.b16 %v1063_v4, %v1063_v4  ;;  %v557_v22 = vshrl.u32 %v3381_v55, 16  ;;  %v2960_v62 = vld [vmem:[%s3245_s19 + $0x50] sm:$0x1] }
  0x38   : > { %2062 = vrot.lane.b32.xlu1 %v1891_v51, %s3200_s21  ;;  %v1902_v51 = vrot.slane %v1900_v41, 1  ;;  %v422_v17 = vrot.slane %v420_v1, 1  ;;  %v612_v21 = vsel %vm600_vm0, %v610_v5, %v611_v6  ;;  %v1129_v27 = vshrl.u32 %v3389_v3, 16 }
  0x39   : > { %594 = vrot.lane.b32.xlu0 %v543_v56, %s3200_s21  ;;  %v358_v56 = vunpack.c.l.b16 %v246_v47  ;;  %v1133_v29 = vrot.slane %v1131_v13, 1  ;;  %v1136_v28 = vshll.u32 %v1079_v20, 16  ;;  %v1325_v40 = vrot.slane %v3389_v3, 1  ;;  %v3440_v13 = vld [vmem:[%s3245_s19 + $0x48] sm:$0xff] }
  0x3a   : > { %v1903_v60 = vsel %vm375_vm1, %v1898_v50, %v1902_v51  ;;  %v423_v30 = vsel %vm375_vm1, %v418_v15, %v422_v17  ;;  %v1326_v41 = vrot.slane %v1079_v20, 1  ;;  %v1064_v47 = vunpack.c.l.b16 %v2826_v36  ;;  %v2850_v15 = vld [vmem:[%s3245_s19 + $0xa4] sm:$0x1] }
  0x3b   : > { %v1134_v37 = vor.u32 %v1133_v29, %v1129_v27  ;;  %v1138_v38 = vrot.slane %v1136_v28, 1  ;;  %v1905_v50 = vshrl.u32 %v3408_v32, 16  ;;  %v1143_v61 = vshll.u32 %v3418_v46, 16 }
  0x3c   : > { %675 = vrot.lane.b32.xlu2 %v642_v11, %s3199_s20  ;;  %v2098_v11 = vrot.slane %v3353_v16, 1  ;;  %v1327_v54 = vsel %vm600_vm0, %v1325_v40, %v1326_v41  ;;  %v646_v6 = vrot.slane %v3381_v55, 1  ;;  %v1141_v17 = vshrl.u32 %v3418_v46, 16  ;;  %v216_v40 = vld [vmem:[%s3245_s19 + $0x44] sm:$0x1] }
  0x3d   : > { %v1139_v49 = vsel %vm375_vm1, %v1134_v37, %v1138_v38  ;;  %v1145_v20 = vrot.slane %v1143_v61, 1  ;;  %v1072_v27 = vunpack.c.l.b16 %v2850_v15  ;;  %v1919_v29 = vshll.u32 %v3440_v13, 16 }
  0x3e   : > { %v2100_v26 = vsel %vm600_vm0, %v2098_v11, %v2099_v12  ;;  %v1917_v41 = vshrl.u32 %v3440_v13, 16 }
  0x3f   : > { %v3458_v38 = vpack.c.b16 %v1072_v27, %v1072_v27  ;;  %v3105_v27 = vld [vmem:[%s3245_s19 + $0x48] sm:$0xff] }
  0x40   : > { %572 = vrot.lane.b32.xlu1 %v411_v8, %s3200_s21  ;;  %v3393_v8 = vpack.c.b16 %v358_v56, %v358_v56  ;;  %v2101_v56 = vrot.slane %v3408_v32, 1 }
  0x41   : > { %2142 = vrot.lane.b32.xlu0 %v2097_v9, %s3199_s20  ;;  %v559_v9 = vshll.u32 %v3381_v55, 16 }
  0x42   : > { %v564_v24 = vshll.u32 %v3393_v8, 16 }
  0x43   : > { %v561_v23 = vrot.slane %v559_v9, 1  ;;  %v647_v9 = vrot.slane %v3393_v8, 1 }
  0x44   : > { %653 = vrot.lane.b32.xlu2 %v609_v35, %s3199_s20  ;;  %v566_v35 = vrot.slane %v564_v24, 1 }
  0x45   : > { %v562_v34 = vor.u32 %v561_v23, %v557_v22  ;;  %v1840_v22 = vunpack.c.l.b16 %v2960_v62  ;;  %v648_v8 = vsel %vm600_vm0, %v646_v6, %v647_v9 }
  0x47   : > { %v567_v45 = vsel %vm375_vm1, %v562_v34, %v566_v35  ;;  %v3453_v28 = vpack.c.b16 %v1840_v22, %v1840_v22 }
  0x48   : > { %1368 = vrot.lane.b32.xlu1 %v1324_v33, %s3199_s20  ;;  %v1839_v33 = vunpack.c.l.b16 %v2957_v25 }
  0x49   : > { %1288 = vrot.lane.b32.xlu0 %v1127_v39, %s3200_s21  ;;  %v1907_v39 = vshll.u32 %v3408_v32, 16 }
  0x4a   : > { %v1855_v44 = vpack.c.b16 %v1839_v33, %v1839_v33 }
  0x4b   : > { %v1909_v51 = vrot.slane %v1907_v39, 1 }
  0x4c   : > { %596 = vrot.lane.b32.xlu2 %v555_v59, %s3200_s21  ;;  %v1912_v52 = vshll.u32 %v1855_v44, 16  ;;  %v2102_v58 = vrot.slane %v1855_v44, 1  ;;  %v347_v59 = vunpack.c.l.b16 %v213_v48  ;;  %v1921_v44 = vrot.slane %v1919_v29, 1 }
  0x4d   : > { %v1910_v1 = vor.u32 %v1909_v51, %v1905_v50  ;;  %v348_v50 = vunpack.c.l.b16 %v216_v40 }
  0x4e   : > { %v1914_v4 = vrot.slane %v1912_v52, 1  ;;  %v2103_v11 = vsel %vm600_vm0, %v2101_v56, %v2102_v58  ;;  %v363_v12 = vpack.c.b16 %v347_v59, %v347_v59  ;;  %v1244_v56 = vshll.u32 %v3458_v38, 16  ;;  %v2794_v58 = vld [vmem:[%s4323_s1] sm:$0xf]  ;;  %v3099_v59 = vld [vmem:[%s4323_s1] sm:$0x30] }
  0x4f   : > { %v1922_v61 = vor.u32 %v1921_v44, %v1917_v41  ;;  %v2795_v62 = vor.u32 %v3099_v59, %v2794_v58  ;;  %v2104_v41 = vrot.slane %v3440_v13, 1  ;;  %v2105_v44 = vrot.slane %v3453_v28, 1  ;;  %v3529_v59 = vld [vmem:[%s3245_s19 + $0xa8] sm:$0xff] }
  0x50   : > { %677 = vrot.lane.b32.xlu1 %v645_v53, %s3199_s20  ;;  %v3426_v53 = vld [vmem:[%s3245_s19 + $0x30] sm:$0xff]  ;;  %v1915_v23 = vsel %vm375_vm1, %v1910_v1, %v1914_v4  ;;  %v432_v55 = vshll.u32 %v363_v12, 16  ;;  %v614_v37 = vrot.slane %v363_v12, 1  ;;  %v1328_v12 = vrot.slane %v3418_v46, 1 }
  0x51   : > { %2064 = vrot.lane.b32.xlu0 %v1903_v60, %s3200_s21  ;;  %v3429_v60 = vpack.c.b16 %v1064_v47, %v1064_v47  ;;  %v427_v5 = vshll.u32 %v3426_v53, 16  ;;  %v425_v24 = vshrl.u32 %v3426_v53, 16  ;;  %v613_v36 = vrot.slane %v3426_v53, 1  ;;  %v3465_v47 = vld [vmem:[%s3245_s19 + $0x3c] sm:$0xff]  ;;  %v3062_v1 = vld [vmem:[%s4323_s1 + $0x10] sm:$0xf] }
  0x52   : > { %v434_v35 = vrot.slane %v432_v55, 1  ;;  %v3133_v4 = vld [vmem:[%s4323_s1 + $0x10] sm:$0x30]  ;;  %v439_v6 = vshll.u32 %v3465_v47, 16  ;;  %v2106_v13 = vsel %vm600_vm0, %v2104_v41, %v2105_v44 }
  0x53   : > { %v429_v25 = vrot.slane %v427_v5, 1  ;;  %v615_v52 = vsel %vm600_vm0, %v613_v36, %v614_v37  ;;  %v3063_v9 = vor.u32 %v3133_v4, %v3062_v1  ;;  %v1329_v15 = vrot.slane %v3429_v60, 1  ;;  %v2963_v36 = vld [vmem:[%s3245_s19 + $0x5c] sm:$0x1] }
  0x54   : > { %2144 = vrot.lane.b32.xlu2 %v2100_v26, %s3199_s20  ;;  %v3449_v26 = vld [vmem:[%s3245_s19 + $0x9c] sm:$0xff] }
  0x55   : > { %v430_v34 = vor.u32 %v429_v25, %v425_v24  ;;  %v1239_v39 = vshll.u32 %v3449_v26, 16  ;;  %v3494_v22 = vsel %vm787_vm2, %v3063_v9, 0  ;;  %v437_v24 = vshrl.u32 %v3465_v47, 16 }
  0x56   : > { %2286 = vmatpush.bf16.msra.mxu2 %v3494_v22  ;;  %v441_v25 = vrot.slane %v439_v6, 1  ;;  %v1330_v55 = vsel %vm600_vm0, %v1328_v12, %v1329_v15  ;;  %v1352_v37 = vrot.slane %v3449_v26, 1  ;;  %v616_v6 = vrot.slane %v3465_v47, 1 }
  0x57   : > { %v435_v51 = vsel %vm375_vm1, %v430_v34, %v434_v35  ;;  %v3116_v34 = vld [vmem:[%s4323_s1 + $0x8] sm:$0x30]  ;;  %v1251_v12 = vshll.u32 %v3529_v59, 16 }
  0x58   : > { %655 = vrot.lane.b32.xlu1 %v612_v21, %s3199_s20  ;;  %v1148_v21 = vshll.u32 %v3429_v60, 16 }
  0x59   : > { %574 = vrot.lane.b32.xlu0 %v423_v30, %s3200_s21  ;;  %v1146_v30 = vor.u32 %v1145_v20, %v1141_v17  ;;  %v789_v17 = vsel %vm787_vm2, %v2795_v62, 0  ;;  %v1331_v62 = vrot.slane %v3105_v27, 1 }
  0x5a   : > { %v1150_v33 = vrot.slane %v1148_v21, 1  ;;  %v1246_v21 = vrot.slane %v1244_v56, 1  ;;  %3134 = vmatpush.bf16.msra.mxu3 %v789_v17  ;;  %798 = vmatpush.bf16.msra.mxu0 %v789_v17 }
  0x5c   : > { %1290 = vrot.lane.b32.xlu2 %v1139_v49, %s3200_s21  ;;  %v1151_v48 = vsel %vm375_vm1, %v1146_v30, %v1150_v33  ;;  %v1237_v49 = vshrl.u32 %v3449_v26, 16  ;;  %v2928_v30 = vld [vmem:[%s4323_s1 + $0x8] sm:$0xf]  ;;  %v442_v33 = vor.u32 %v441_v25, %v437_v24 }
  0x5d   : > { %v2929_v40 = vor.u32 %v3116_v34, %v2928_v30 }
  0x60   : > { %598 = vrot.lane.b32.xlu1 %v567_v45, %s3200_s21  ;;  %v1924_v45 = vshll.u32 %v3453_v28, 16  ;;  %v1153_v28 = vshrl.u32 %v3105_v27, 16 }
  0x61   : > { %1370 = vrot.lane.b32.xlu0 %v1327_v54, %s3199_s20  ;;  %v1241_v54 = vrot.slane %v1239_v39, 1  ;;  %v1353_v39 = vrot.slane %v3458_v38, 1 }
  0x62   : > { %v1926_v5 = vrot.slane %v1924_v45, 1 }
  0x63   : > { %v1242_v20 = vor.u32 %v1241_v54, %v1237_v49  ;;  %v1841_v54 = vunpack.c.l.b16 %v2963_v36  ;;  %v1354_v38 = vsel %vm600_vm0, %v1352_v37, %v1353_v39 }
  0x64   : > { %2066 = vrot.lane.b32.xlu2 %v1915_v23, %s3200_s21  ;;  %v2829_v23 = vld [vmem:[%s3245_s19 + $0x50] sm:$0x1]  ;;  %v1927_v46 = vsel %vm375_vm1, %v1922_v61, %v1926_v5 }
  0x65   : > { %v1065_v29 = vunpack.c.l.b16 %v2829_v23  ;;  %v3532_v4 = vpack.c.b16 %v1841_v54, %v1841_v54  ;;  %v219_v23 = vld [vmem:[%s3245_s19 + $0x50] sm:$0x1] }
  0x66   : > { %v349_v30 = vunpack.c.l.b16 %v219_v23 }
  0x67   : > { %v1081_v45 = vpack.c.b16 %v1065_v29, %v1065_v29  ;;  %v3089_v29 = vld [vmem:[%s3245_s19 + $0x48] sm:$0xff]  ;;  %v2108_v23 = vrot.slane %v3532_v4, 1 }
  0x68   : > { %2146 = vrot.lane.b32.xlu1 %v2103_v11, %s3199_s20  ;;  %v3488_v11 = vpack.c.b16 %v348_v50, %v348_v50  ;;  %v1501_v50 = vsel %vm787_vm2, %v2929_v40, 0  ;;  %v365_v44 = vpack.c.b16 %v349_v30, %v349_v30 }
  0x69   : > { %679 = vrot.lane.b32.xlu0 %v648_v8, %s3199_s20  ;;  %v1247_v8 = vsel %vm375_vm1, %v1242_v20, %v1246_v21  ;;  %1510 = vmatpush.bf16.msra.mxu1 %v1501_v50  ;;  %v1160_v58 = vshll.u32 %v1081_v45, 16  ;;  %v1332_v1 = vrot.slane %v1081_v45, 1  ;;  %v451_v45 = vshll.u32 %v3089_v29, 16 }
  0x6a   : > { %v444_v60 = vshll.u32 %v3488_v11, 16  ;;  %3135 = vmatpush.bf16.msrb.mxu3 %v1501_v50  ;;  %v617_v9 = vrot.slane %v3488_v11, 1  ;;  %v1249_v11 = vshrl.u32 %v3529_v59, 16 }
  0x6b   : > { %v1162_v17 = vrot.slane %v1160_v58, 1  ;;  %v1333_v24 = vsel %vm600_vm0, %v1331_v62, %v1332_v1  ;;  %v453_v58 = vrot.slane %v451_v45, 1  ;;  %v3567_v62 = vld [vmem:[%s3245_s19 + $0x54] sm:$0xff] }
  0x6c   : > { %576 = vrot.lane.b32.xlu2 %v435_v51, %s3200_s21  ;;  %v446_v35 = vrot.slane %v444_v60, 1  ;;  %v2853_v51 = vld [vmem:[%s3245_s19 + $0xb0] sm:$0x1]  ;;  %v1936_v60 = vshll.u32 %v3532_v4, 16  ;;  %v618_v47 = vsel %vm600_vm0, %v616_v6, %v617_v9 }
  0x6d   : > { %v1073_v61 = vunpack.c.l.b16 %v2853_v51  ;;  %v3560_v51 = vld [vmem:[%s3245_s19 + $0xb4] sm:$0xff] }
  0x6e   : > { %v447_v26 = vsel %vm375_vm1, %v442_v33, %v446_v35  ;;  %v1355_v33 = vrot.slane %v3529_v59, 1  ;;  %v2856_v35 = vld [vmem:[%s3245_s19 + $0xbc] sm:$0x1]  ;;  %v1938_v37 = vrot.slane %v1936_v60, 1  ;;  %v1263_v6 = vshll.u32 %v3560_v51, 16 }
  0x6f   : > { %v1089_v21 = vpack.c.b16 %v1073_v61, %v1073_v61  ;;  %v1074_v54 = vunpack.c.l.b16 %v2856_v35  ;;  %v456_v61 = vshll.u32 %v365_v44, 16  ;;  %v3598_v35 = vld [vmem:[%s3245_s19 + $0x60] sm:$0xff] }
  0x70   : > { %1292 = vrot.lane.b32.xlu1 %v1151_v48, %s3200_s21  ;;  %v1155_v48 = vshll.u32 %v3105_v27, 16 }
  0x71   : > { %657 = vrot.lane.b32.xlu0 %v615_v52, %s3199_s20  ;;  %v3523_v52 = vld [vmem:[%s3245_s19 + $0x54] sm:$0xff]  ;;  %v1356_v34 = vrot.slane %v1089_v21, 1 }
  0x72   : > { %v1157_v56 = vrot.slane %v1155_v48, 1  ;;  %v1931_v5 = vshll.u32 %v3523_v52, 16  ;;  %v1929_v25 = vshrl.u32 %v3523_v52, 16 }
  0x74   : > { %1372 = vrot.lane.b32.xlu2 %v1330_v55, %s3199_s20  ;;  %v1158_v15 = vor.u32 %v1157_v56, %v1153_v28  ;;  %v1253_v55 = vrot.slane %v1251_v12, 1  ;;  %v449_v56 = vshrl.u32 %v3089_v29, 16  ;;  %v1167_v12 = vshll.u32 %v3567_v62, 16 }
  0x76   : > { %v3518_v49 = vpop.permute.xlu2 %592  ;;  %v1163_v27 = vsel %vm375_vm1, %v1158_v15, %v1162_v17  ;;  %v1254_v39 = vor.u32 %v1253_v55, %v1249_v11  ;;  %v619_v15 = vrot.slane %v3089_v29, 1  ;;  %v620_v17 = vrot.slane %v365_v44, 1 }
  0x77   : > { %v1261_v55 = vshrl.u32 %v3560_v51, 16 }
  0x78   : > { %2068 = vrot.lane.b32.xlu1 %v1927_v46, %s3200_s21  ;;  %v1933_v46 = vrot.slane %v1931_v5, 1  ;;  %v3569_v5 = vpack.c.b16 %v1074_v54, %v1074_v54  ;;  %v621_v30 = vsel %vm600_vm0, %v619_v15, %v620_v17  ;;  %v1943_v54 = vshll.u32 %v3598_v35, 16  ;;  %v222_v15 = vld [vmem:[%s3245_s19 + $0x5c] sm:$0x1] }
  0x79   : > { %1308 = vrot.lane.b32.xlu0 %v1247_v8, %s3200_s21  ;;  %v1256_v8 = vshll.u32 %v1089_v21, 16  ;;  %v2107_v21 = vrot.slane %v3523_v52, 1 }
  0x7a   : > { %v1934_v36 = vor.u32 %v1933_v46, %v1929_v25  ;;  %v458_v25 = vrot.slane %v456_v61, 1  ;;  %v1268_v52 = vshll.u32 %v3569_v5, 16  ;;  %v3611_v61 = vld [vmem:[%s3245_s19 + $0x60] sm:$0xff] }
  0x7b   : > { %v1258_v40 = vrot.slane %v1256_v8, 1  ;;  %v1265_v8 = vrot.slane %v1263_v6, 1 }
  0x7c   : > { %1388 = vrot.lane.b32.xlu2 %v1354_v38, %s3199_s20  ;;  %v1357_v38 = vsel %vm600_vm0, %v1355_v33, %v1356_v34  ;;  %v2109_v33 = vsel %vm600_vm0, %v2107_v21, %v2108_v23  ;;  %v1941_v21 = vshrl.u32 %v3598_v35, 16  ;;  %v1945_v23 = vrot.slane %v1943_v54, 1 }
  0x7d   : > { %v1259_v28 = vsel %vm375_vm1, %v1254_v39, %v1258_v40  ;;  %v1270_v39 = vrot.slane %v1268_v52, 1  ;;  %v2835_v40 = vld [vmem:[%s3245_s19 + $0x68] sm:$0x1] }
  0x7e   : > { %v2061_v20 = vpop.permute.xlu2 %2060 }
  0x7f   : > { %v2173_v9 = vsel %vm681_vm3, %v3260_v14, %v2061_v20  ;;  %v454_v20 = vor.u32 %v453_v58, %v449_v56 }
  0x80   : > { %578 = vrot.lane.b32.xlu1 %v447_v26, %s3200_s21  ;;  %v2832_v26 = vld [vmem:[%s3245_s19 + $0x5c] sm:$0x1] }
  0x81   : > { %2148 = vrot.lane.b32.xlu0 %v2106_v13, %s3199_s20  ;;  %v1939_v13 = vsel %vm375_vm1, %v1934_v36, %v1938_v37  ;;  %v1066_v1 = vunpack.c.l.b16 %v2832_v26  ;;  %v459_v34 = vsel %vm375_vm1, %v454_v20, %v458_v25  ;;  %v1266_v37 = vor.u32 %v1265_v8, %v1261_v55  ;;  %v3630_v20 = vld [vmem:[%s3245_s19 + $0x54] sm:$0xff] }
  0x82   : > { %v350_v25 = vunpack.c.l.b16 %v222_v15  ;;  %v463_v8 = vshll.u32 %v3630_v20, 16  ;;  %v622_v15 = vrot.slane %v3630_v20, 1 }
  0x83   : > { %v1082_v46 = vpack.c.b16 %v1066_v1, %v1066_v1  ;;  %v1067_v1 = vunpack.c.l.b16 %v2835_v40 }
  0x84   : > { %659 = vrot.lane.b32.xlu2 %v618_v47, %s3199_s20 }
  0x85   : > { %v1172_v29 = vshll.u32 %v1082_v46, 16 }
  0x86   : > { %v3555_v48 = vpop.permute.xlu2 %570 }
  0x87   : > { %v1174_v45 = vrot.slane %v1172_v29, 1  ;;  %v1177_v29 = vshrl.u32 %v3611_v61, 16 }
  0x88   : > { %1374 = vrot.lane.b32.xlu1 %v1333_v24, %s3199_s20  ;;  %v707_v24 = vsel %vm681_vm3, %v3263_v18, %v3518_v49  ;;  %v2966_v18 = vld [vmem:[%s3245_s19 + $0x68] sm:$0x1]  ;;  %v1165_v49 = vshrl.u32 %v3567_v62, 16 }
  0x89   : > { %1294 = vrot.lane.b32.xlu0 %v1163_v27, %s3200_s21  ;;  %v1169_v27 = vrot.slane %v1167_v12, 1  ;;  %v1842_v36 = vunpack.c.l.b16 %v2966_v18  ;;  %v1271_v12 = vsel %vm375_vm1, %v1266_v37, %v1270_v39  ;;  %v1359_v18 = vrot.slane %v3569_v5, 1  ;;  %v3647_v39 = vld [vmem:[%s3245_s19 + $0x6c] sm:$0xff] }
  0x8a   : > { %v3553_v41 = vpop.permute.xlu1 %1364  ;;  %v461_v5 = vshrl.u32 %v3630_v20, 16 }
  0x8b   : > { %v3557_v50 = vpop.permute.xlu0 %649  ;;  %v1170_v44 = vor.u32 %v1169_v27, %v1165_v49  ;;  %v1858_v58 = vpack.c.b16 %v1842_v36, %v1842_v36  ;;  %v2859_v36 = vld [vmem:[%s3245_s19 + $0xc8] sm:$0x1] }
  0x8c   : > { %1310 = vrot.lane.b32.xlu2 %v1259_v28, %s3200_s21 }
  0x8d   : > { %v1175_v17 = vsel %vm375_vm1, %v1170_v44, %v1174_v45  ;;  %v465_v44 = vrot.slane %v463_v8, 1 }
  0x8e   : > { %v3583_v60 = vpop.permute.xlu2 %1366 }
  0x90   : > { %1390 = vrot.lane.b32.xlu1 %v1357_v38, %s3199_s20  ;;  %v1335_v38 = vrot.slane %v1082_v46, 1  ;;  %v2111_v46 = vrot.slane %v1858_v58, 1 }
  0x91   : > { %2070 = vrot.lane.b32.xlu0 %v1939_v13, %s3200_s21 }
  0x92   : > { %v2141_v14 = vpop.permute.xlu1 %2140 }
  0x93   : > { %v674_v47 = vpop.permute.xlu0 %673  ;;  %v2205_v11 = vsel %vm714_vm4, %v2173_v9, %v2141_v14  ;;  %v1179_v14 = vshll.u32 %v3611_v61, 16 }
  0x94   : > { %v740_v4 = vsel %vm714_vm4, %v707_v24, %v674_v47  ;;  %3064 = vmatmul.msk.bf16.vlgmr.msra.gmra.mxu2 %vm754_vm5, %v2205_v11  ;;  %2150 = vrot.lane.b32.xlu2 %v2109_v33, %s3199_s20  ;;  %v1948_v24 = vshll.u32 %v1858_v58, 16  ;;  %v2969_v47 = vld [vmem:[%s3245_s19 + $0x74] sm:$0x1]  ;;  %v1946_v11 = vor.u32 %v1945_v23, %v1941_v21  ;;  %v1955_v58 = vshll.u32 %v3647_v39, 16 }
  0x95   : > { %2808 = vmatmul.msk.bf16.vlgmr.msra.gmra.mxu3 %vm754_vm5, %v740_v4  ;;  %v1358_v4 = vrot.slane %v3560_v51, 1  ;;  %v1843_v40 = vunpack.c.l.b16 %v2969_v47 }
  0x96   : > { %3136 = vmatpush.bf16.msra.mxu3 %v3494_v22  ;;  %v1334_v22 = vrot.slane %v3567_v62, 1  ;;  %v3606_v13 = vpop.permute.xlu2 %675  ;;  %v1950_v55 = vrot.slane %v1948_v24, 1  ;;  %v225_v24 = vld [vmem:[%s3245_s19 + $0x68] sm:$0x1]  ;;  %v1957_v47 = vrot.slane %v1955_v58, 1 }
  0x97   : > { %v1360_v54 = vsel %vm600_vm0, %v1358_v4, %v1359_v18 }
  0x98   : > { %661 = vrot.lane.b32.xlu1 %v621_v30, %s3199_s20  ;;  %v1181_v30 = vrot.slane %v1179_v14, 1  ;;  %v1951_v51 = vsel %vm375_vm1, %v1946_v11, %v1950_v55 }
  0x99   : > { %580 = vrot.lane.b32.xlu0 %v459_v34, %s3200_s21  ;;  %v366_v34 = vpack.c.b16 %v350_v25, %v350_v25  ;;  %v1953_v25 = vshrl.u32 %v3647_v39, 16 }
  0x9a   : > { %v1285_v26 = vpop.permute.xlu1 %1284 }
  0x9b   : > { %v1397_v28 = vsel %vm681_vm3, %v3248_v0, %v1285_v26  ;;  %v569_v56 = vpop.permute.xlu0 %568  ;;  %v468_v45 = vshll.u32 %v366_v34, 16  ;;  %v3653_v26 = vld [vmem:[%s3245_s19 + $0xc0] sm:$0xff] }
  0x9c   : > { %v683_v6 = vsel %vm681_vm3, %v3252_v2, %v569_v56  ;;  %v1429_v9 = vsel %vm714_vm4, %v1397_v28, %v3553_v41  ;;  %v1336_v2 = vsel %vm600_vm0, %v1334_v22, %v1335_v38  ;;  %v3626_v41 = vpack.c.b16 %v1067_v1, %v1067_v1  ;;  %1296 = vrot.lane.b32.xlu2 %v1175_v17, %s3200_s21 }
  0x9d   : > { %v716_v0 = vsel %vm714_vm4, %v683_v6, %v3557_v50  ;;  %2930 = vmatmul.msk.bf16.vlgmr.msra.gmra.mxu1 %vm754_vm5, %v1429_v9  ;;  %v2110_v50 = vrot.slane %v3598_v35, 1  ;;  %v1075_v22 = vunpack.c.l.b16 %v2859_v36  ;;  %v1182_v38 = vor.u32 %v1181_v30, %v1177_v29 }
  0x9e   : > { %2796 = vmatmul.msk.bf16.vlgmr.msra.gmra.mxu0 %vm754_vm5, %v716_v0  ;;  %v3640_v49 = vpop.permute.xlu2 %653  ;;  %v1184_v33 = vshll.u32 %v3626_v41, 16  ;;  %v3656_v56 = vpack.c.b16 %v1843_v40, %v1843_v40  ;;  %v466_v6 = vor.u32 %v465_v44, %v461_v5  ;;  %v470_v9 = vrot.slane %v468_v45, 1 }
  0x9f   : > { %v2112_v37 = vsel %vm600_vm0, %v2110_v50, %v2111_v46  ;;  %v623_v17 = vrot.slane %v366_v34, 1  ;;  %v3664_v0 = vpack.c.b16 %v1075_v22, %v1075_v22  ;;  %v1275_v21 = vshll.u32 %v3653_v26, 16 }
  0xa0   : > { %1312 = vrot.lane.b32.xlu1 %v1271_v12, %s3200_s21  ;;  %v1186_v28 = vrot.slane %v1184_v33, 1  ;;  %v1960_v11 = vshll.u32 %v3656_v56, 16  ;;  %v2838_v33 = vld [vmem:[%s3245_s19 + $0x74] sm:$0x1]  ;;  %v1337_v34 = vrot.slane %v3611_v61, 1  ;;  %v1338_v36 = vrot.slane %v3626_v41, 1 }
  0xa1   : > { %1376 = vrot.lane.b32.xlu0 %v1336_v2, %s3199_s20  ;;  %v1277_v4 = vrot.slane %v1275_v21, 1  ;;  %v1280_v18 = vshll.u32 %v3664_v0, 16  ;;  %v1361_v21 = vrot.slane %v3653_v26, 1 }
  0xa2   : > { %v1287_v52 = vpop.permute.xlu1 %1286  ;;  %v1187_v14 = vsel %vm375_vm1, %v1182_v38, %v1186_v28  ;;  %v3709_v38 = vld [vmem:[%s3245_s19 + $0x6c] sm:$0xff]  ;;  %v1068_v28 = vunpack.c.l.b16 %v2838_v33 }
  0xa3   : > { %v652_v27 = vpop.permute.xlu0 %651  ;;  %v1399_v1 = vsel %vm681_vm3, %v3280_v42, %v1287_v52  ;;  %v685_v42 = vsel %vm681_vm3, %v3297_v63, %v3555_v48  ;;  %v3685_v63 = vld [vmem:[%s3245_s19 + $0x60] sm:$0xff]  ;;  %v351_v48 = vunpack.c.l.b16 %v225_v24  ;;  %v471_v52 = vsel %vm375_vm1, %v466_v6, %v470_v9 }
  0xa4   : > { %2072 = vrot.lane.b32.xlu2 %v1951_v51, %s3200_s21  ;;  %v1431_v46 = vsel %vm714_vm4, %v1399_v1, %v3583_v60  ;;  %v718_v55 = vsel %vm714_vm4, %v685_v42, %v652_v27  ;;  %v1273_v60 = vshrl.u32 %v3653_v26, 16  ;;  %v1962_v27 = vrot.slane %v1960_v11, 1 }
  0xa5   : > { %v3696_v29 = vpack.c.b16 %v351_v48, %v351_v48  ;;  %v475_v30 = vshll.u32 %v3685_v63, 16  ;;  %v1282_v51 = vrot.slane %v1280_v18, 1  ;;  %v473_v41 = vshrl.u32 %v3685_v63, 16  ;;  %v2972_v48 = vld [vmem:[%s3245_s19 + $0x80] sm:$0x1] }
  0xa6   : > { %v3667_v23 = vpop.permute.xlu2 %596  ;;  %v1278_v40 = vor.u32 %v1277_v4, %v1273_v60  ;;  %v1339_v6 = vsel %vm600_vm0, %v1337_v34, %v1338_v36  ;;  %v1362_v24 = vrot.slane %v3664_v0, 1  ;;  %v3742_v60 = vld [vmem:[%s3245_s19 + $0xa8] sm:$0xff]  ;;  %v1340_v18 = vrot.slane %v3709_v38, 1 }
  0xa7   : > { %v477_v58 = vrot.slane %v475_v30, 1  ;;  %v480_v1 = vshll.u32 %v3696_v29, 16  ;;  %v625_v34 = vrot.slane %v3685_v63, 1  ;;  %v626_v36 = vrot.slane %v3696_v29, 1 }
  0xa8   : > { %2152 = vrot.lane.b32.xlu1 %v2112_v37, %s3199_s20  ;;  %v1283_v9 = vsel %vm375_vm1, %v1278_v40, %v1282_v51  ;;  %v711_v40 = vsel %vm681_vm3, %v3356_v19, %v3667_v23 }
  0xa9   : > { %1392 = vrot.lane.b32.xlu0 %v1360_v54, %s3199_s20 }
  0xaa   : > { %v2063_v12 = vpop.permute.xlu1 %2062 }
  0xab   : > { %v595_v2 = vpop.permute.xlu0 %594  ;;  %v2175_v44 = vsel %vm681_vm3, %v3303_v7, %v2063_v12  ;;  %v1084_v7 = vpack.c.b16 %v1068_v28, %v1068_v28  ;;  %v1191_v12 = vshll.u32 %v3709_v38, 16 }
  0xac   : > { %v709_v50 = vsel %vm681_vm3, %v3307_v10, %v595_v2  ;;  %v624_v10 = vsel %vm600_vm0, %v622_v15, %v623_v17  ;;  %582 = vrot.lane.b32.xlu2 %v471_v52, %s3200_s21  ;;  %v478_v15 = vor.u32 %v477_v58, %v473_v41  ;;  %v482_v17 = vrot.slane %v480_v1, 1  ;;  %v228_v41 = vld [vmem:[%s3245_s19 + $0x74] sm:$0x1] }
  0xad   : > { %v742_v8 = vsel %vm714_vm4, %v709_v50, %v3606_v13  ;;  %2931 = vmatmul.msk.bf16.gmra.mxu1 %vm754_vm5, %v1431_v46  ;;  %v1958_v13 = vor.u32 %v1957_v47, %v1953_v25  ;;  %v2114_v25 = vrot.slane %v3656_v56, 1  ;;  %v2984_v47 = vld [vmem:[%s3245_s19 + $0xb0] sm:$0x1]  ;;  %v1193_v0 = vrot.slane %v1191_v12, 1 }
  0xae   : > { %2797 = vmatmul.msk.bf16.gmra.mxu0 %vm754_vm5, %v718_v55  ;;  %2809 = vmatmul.msk.bf16.gmra.mxu3 %vm754_vm5, %v742_v8  ;;  %v3702_v5 = vpop.permute.xlu2 %2144  ;;  %v1189_v55 = vshrl.u32 %v3709_v38, 16  ;;  %v1196_v8 = vshll.u32 %v1084_v7, 16  ;;  %v483_v56 = vsel %vm375_vm1, %v478_v15, %v482_v17  ;;  %v1848_v4 = vunpack.c.l.b16 %v2984_v47 }
  0xaf   : > { %v1963_v22 = vsel %vm375_vm1, %v1958_v13, %v1962_v27  ;;  %v1341_v13 = vrot.slane %v1084_v7, 1  ;;  %v3746_v27 = vld [vmem:[%s3245_s19 + $0x78] sm:$0xff]  ;;  %v627_v1 = vsel %vm600_vm0, %v625_v34, %v626_v36 }
  0xb0   : > { %1298 = vrot.lane.b32.xlu1 %v1187_v14, %s3200_s21  ;;  %v2113_v14 = vrot.slane %v3647_v39, 1  ;;  %v1194_v30 = vor.u32 %v1193_v0, %v1189_v55  ;;  %v1198_v33 = vrot.slane %v1196_v8, 1  ;;  %v3801_v36 = vld [vmem:[%s3245_s19 + $0x78] sm:$0xff] }
  0xb1   : > { %663 = vrot.lane.b32.xlu0 %v624_v10, %s3199_s20  ;;  %v1363_v10 = vsel %vm600_vm0, %v1361_v21, %v1362_v24  ;;  %v1342_v19 = vsel %vm600_vm0, %v1340_v18, %v1341_v13  ;;  %v3777_v21 = vld [vmem:[%s3245_s19 + $0x6c] sm:$0xff]  ;;  %v352_v24 = vunpack.c.l.b16 %v228_v41 }
  0xb2   : > { %v573_v37 = vpop.permute.xlu1 %572  ;;  %v1199_v23 = vsel %vm375_vm1, %v1194_v30, %v1198_v33  ;;  %v487_v0 = vshll.u32 %v3777_v21, 16 }
  0xb3   : > { %v2143_v45 = vpop.permute.xlu0 %2142  ;;  %v687_v42 = vsel %vm681_vm3, %v3320_v31, %v573_v37  ;;  %v1967_v37 = vshll.u32 %v3746_v27, 16  ;;  %v368_v55 = vpack.c.b16 %v352_v24, %v352_v24 }
  0xb4   : > { %v2207_v54 = vsel %vm714_vm4, %v2175_v44, %v2143_v45  ;;  %1378 = vrot.lane.b32.xlu2 %v1339_v6, %s3199_s20  ;;  %v720_v31 = vsel %vm714_vm4, %v687_v42, %v3640_v49  ;;  %v1844_v49 = vunpack.c.l.b16 %v2972_v48  ;;  %v3757_v44 = vpack.c.b16 %v1848_v4, %v1848_v4 }
  0xb5   : > { %3065 = vmatmul.msk.bf16.gmra.mxu2 %vm754_vm5, %v2207_v54  ;;  %v2015_v45 = vshll.u32 %v3742_v60, 16  ;;  %v1969_v7 = vrot.slane %v1967_v37, 1  ;;  %v489_v30 = vrot.slane %v487_v0, 1  ;;  %v492_v33 = vshll.u32 %v368_v55, 16 }
  0xb6   : > { %v3726_v50 = vpop.permute.xlu2 %1290  ;;  %v1860_v29 = vpack.c.b16 %v1844_v49, %v1844_v49  ;;  %v2020_v17 = vshll.u32 %v3757_v44, 16  ;;  %v485_v49 = vshrl.u32 %v3777_v21, 16  ;;  %v629_v34 = vrot.slane %v368_v55, 1 }
  0xb7   : > { %v2017_v15 = vrot.slane %v2015_v45, 1  ;;  %v2128_v45 = vrot.slane %v3742_v60, 1 }
  0xb8   : > { %2074 = vrot.lane.b32.xlu1 %v1963_v22, %s3200_s21  ;;  %v1972_v12 = vshll.u32 %v1860_v29, 16  ;;  %v2117_v42 = vrot.slane %v1860_v29, 1  ;;  %v490_v41 = vor.u32 %v489_v30, %v485_v49  ;;  %v3844_v30 = vld [vmem:[%s3245_s19 + $0x84] sm:$0xff] }
  0xb9   : > { %1314 = vrot.lane.b32.xlu0 %v1283_v9, %s3200_s21  ;;  %v1965_v9 = vshrl.u32 %v3746_v27, 16 }
  0xba   : > { %v1369_v2 = vpop.permute.xlu1 %1368 }
  0xbb   : > { %v1289_v46 = vpop.permute.xlu0 %1288 }
  0xbc   : > { %v1401_v11 = vsel %vm681_vm3, %v3338_v57, %v1289_v46  ;;  %v2115_v57 = vsel %vm600_vm0, %v2113_v14, %v2114_v25  ;;  %1394 = vrot.lane.b32.xlu2 %v1363_v10, %s3199_s20  ;;  %v1970_v14 = vor.u32 %v1969_v7, %v1965_v9  ;;  %v1974_v25 = vrot.slane %v1972_v12, 1  ;;  %v2841_v10 = vld [vmem:[%s3245_s19 + $0x80] sm:$0x1]  ;;  %v2987_v7 = vld [vmem:[%s3245_s19 + $0xbc] sm:$0x1] }
  0xbd   : > { %v1433_v52 = vsel %vm714_vm4, %v1401_v11, %v1369_v2  ;;  %v2975_v2 = vld [vmem:[%s3245_s19 + $0x8c] sm:$0x1]  ;;  %v2022_v11 = vrot.slane %v2020_v17, 1  ;;  %v1069_v37 = vunpack.c.l.b16 %v2841_v10 }
  0xbe   : > { %2798 = vmatmul.msk.bf16.gmra.mxu0 %vm754_vm5, %v720_v31  ;;  %2932 = vmatmul.msk.bf16.gmra.mxu1 %vm754_vm5, %v1433_v52  ;;  %v3760_v54 = vpop.permute.xlu2 %2066  ;;  %v3790_v52 = vld [vmem:[%s3245_s19 + $0x84] sm:$0xff]  ;;  %v1975_v18 = vsel %vm375_vm1, %v1970_v14, %v1974_v25 }
  0xbf   : > { %v1085_v9 = vpack.c.b16 %v1069_v37, %v1069_v37  ;;  %v2179_v0 = vsel %vm681_vm3, %v3408_v32, %v3760_v54 }
  0xc0   : > { %584 = vrot.lane.b32.xlu1 %v483_v56, %s3200_s21  ;;  %v1845_v56 = vunpack.c.l.b16 %v2975_v2  ;;  %v3827_v2 = vld [vmem:[%s3245_s19 + $0xb4] sm:$0xff] }
  0xc1   : > { %2154 = vrot.lane.b32.xlu0 %v2115_v57, %s3199_s20  ;;  %v1208_v24 = vshll.u32 %v1085_v9, 16  ;;  %v2027_v55 = vshll.u32 %v3827_v2, 16  ;;  %v2025_v37 = vshrl.u32 %v3827_v2, 16 }
  0xc2   : > { %v678_v51 = vpop.permute.xlu1 %677 }
  0xc3   : > { %v2065_v22 = vpop.permute.xlu0 %2064  ;;  %v744_v28 = vsel %vm714_vm4, %v711_v40, %v678_v51  ;;  %v3804_v40 = vpack.c.b16 %v1845_v56, %v1845_v56  ;;  %v1979_v51 = vshll.u32 %v3790_v52, 16  ;;  %v1344_v56 = vrot.slane %v1085_v9, 1 }
  0xc4   : > { %v2177_v58 = vsel %vm681_vm3, %v3353_v16, %v2065_v22  ;;  %2810 = vmatmul.msk.bf16.gmra.mxu3 %vm754_vm5, %v744_v28  ;;  %v2013_v16 = vshrl.u32 %v3742_v60, 16  ;;  %665 = vrot.lane.b32.xlu2 %v627_v1, %s3199_s20  ;;  %v2129_v22 = vrot.slane %v3757_v44, 1  ;;  %v1203_v28 = vshll.u32 %v3801_v36, 16 }
  0xc5   : > { %v2209_v6 = vsel %vm714_vm4, %v2177_v58, %v3702_v5  ;;  %v2116_v5 = vrot.slane %v3746_v27, 1  ;;  %v494_v58 = vrot.slane %v492_v33, 1  ;;  %v1977_v44 = vshrl.u32 %v3790_v52, 16 }
  0xc6   : > { %3066 = vmatmul.msk.bf16.gmra.mxu2 %vm754_vm5, %v2209_v6  ;;  %v2018_v47 = vor.u32 %v2017_v15, %v2013_v16  ;;  %v3785_v8 = vpop.permute.xlu2 %576  ;;  %v1981_v16 = vrot.slane %v1979_v51, 1  ;;  %v1984_v15 = vshll.u32 %v3804_v40, 16  ;;  %v2130_v17 = vsel %vm600_vm0, %v2128_v45, %v2129_v22 }
  0xc7   : > { %v2118_v4 = vsel %vm600_vm0, %v2116_v5, %v2117_v42  ;;  %v495_v5 = vsel %vm375_vm1, %v490_v41, %v494_v58  ;;  %v1849_v42 = vunpack.c.l.b16 %v2987_v7  ;;  %v2029_v51 = vrot.slane %v2027_v55, 1  ;;  %v3857_v58 = vld [vmem:[%s3245_s19 + $0x78] sm:$0xff]  ;;  %v3885_v55 = vld [vmem:[%s3245_s19 + $0xc0] sm:$0xff] }
  0xc8   : > { %1380 = vrot.lane.b32.xlu1 %v1342_v19, %s3199_s20  ;;  %v2023_v13 = vsel %vm375_vm1, %v2018_v47, %v2022_v11  ;;  %v1982_v14 = vor.u32 %v1981_v16, %v1977_v44  ;;  %v1986_v25 = vrot.slane %v1984_v15, 1  ;;  %v1210_v11 = vrot.slane %v1208_v24, 1  ;;  %v3166_v24 = vld [vmem:[%s3245_s19 + $0x3c] sm:$0xff] }
  0xc9   : > { %1300 = vrot.lane.b32.xlu0 %v1199_v23, %s3200_s21  ;;  %v1403_v23 = vsel %vm681_vm3, %v3389_v3, %v3726_v50  ;;  %v1201_v3 = vshrl.u32 %v3801_v36, 16  ;;  %v1205_v50 = vrot.slane %v1203_v28, 1  ;;  %v1865_v10 = vpack.c.b16 %v1849_v42, %v1849_v42 }
  0xca   : > { %v656_v46 = vpop.permute.xlu1 %655  ;;  %v1987_v32 = vsel %vm375_vm1, %v1982_v14, %v1986_v25  ;;  %v2131_v28 = vrot.slane %v3827_v2, 1  ;;  %v1215_v41 = vshll.u32 %v3844_v30, 16  ;;  %v2030_v9 = vor.u32 %v2029_v51, %v2025_v37 }
  0xcb   : > { %v575_v48 = vpop.permute.xlu0 %574  ;;  %v1206_v47 = vor.u32 %v1205_v50, %v1201_v3  ;;  %v2032_v45 = vshll.u32 %v1865_v10, 16  ;;  %v691_v44 = vsel %vm681_vm3, %v3426_v53, %v3785_v8  ;;  %v2120_v3 = vrot.slane %v3804_v40, 1  ;;  %v2978_v53 = vld [vmem:[%s3245_s19 + $0x98] sm:$0x1] }
  0xcc   : > { %v689_v31 = vsel %vm681_vm3, %v3372_v43, %v575_v48  ;;  %v628_v43 = vrot.slane %v3777_v21, 1  ;;  %2076 = vrot.lane.b32.xlu2 %v1975_v18, %s3200_s21  ;;  %v1213_v14 = vshrl.u32 %v3844_v30, 16  ;;  %v1217_v25 = vrot.slane %v1215_v41, 1  ;;  %v3167_v41 = vld [vmem:[%s3245_s19 + $0x9c] sm:$0xff] }
  0xcd   : > { %v722_v57 = vsel %vm714_vm4, %v689_v31, %v656_v46  ;;  %v2844_v46 = vld [vmem:[%s3245_s19 + $0x8c] sm:$0x1]  ;;  %v1343_v31 = vrot.slane %v3801_v36, 1  ;;  %v2034_v7 = vrot.slane %v2032_v45, 1  ;;  %v631_v37 = vrot.slane %v3857_v58, 1 }
  0xce   : > { %2799 = vmatmul.msk.bf16.gmra.mxu0 %vm754_vm5, %v722_v57  ;;  %v3812_v19 = vpop.permute.xlu2 %1372  ;;  %v630_v6 = vsel %vm600_vm0, %v628_v43, %v629_v34  ;;  %v1070_v54 = vunpack.c.l.b16 %v2844_v46  ;;  %v231_v43 = vld [vmem:[%s3245_s19 + $0x80] sm:$0x1]  ;;  %v1211_v34 = vsel %vm375_vm1, %v1206_v47, %v1210_v11 }
  0xcf   : > { %v1345_v22 = vsel %vm600_vm0, %v1343_v31, %v1344_v56 }
  0xd0   : > { %2156 = vrot.lane.b32.xlu1 %v2118_v4, %s3199_s20  ;;  %v3165_v4 = vld [vmem:[%s3245_s19 + $0xb4] sm:$0xff] }
  0xd1   : > { %2084 = vrot.lane.b32.xlu0 %v2023_v13, %s3200_s21 }
  0xd2   : > { %v599_v29 = vpop.permute.xlu1 %598 }
  0xd3   : > { %v1371_v1 = vpop.permute.xlu0 %1370  ;;  %v713_v18 = vsel %vm681_vm3, %v3165_v4, %v599_v29  ;;  %v2132_v29 = vrot.slane %v1865_v10, 1  ;;  %v3891_v4 = vld [vmem:[%s3245_s19 + $0x90] sm:$0xff] }
  0xd4   : > { %v1435_v12 = vsel %vm714_vm4, %v1403_v23, %v1371_v1  ;;  %2164 = vrot.lane.b32.xlu2 %v2130_v17, %s3199_s20  ;;  %v353_v23 = vunpack.c.l.b16 %v231_v43  ;;  %v3860_v1 = vpack.c.b16 %v1070_v54, %v1070_v54  ;;  %v2119_v17 = vrot.slane %v3790_v52, 1 }
  0xd5   : > { %2933 = vmatmul.msk.bf16.gmra.mxu1 %vm754_vm5, %v1435_v12  ;;  %v499_v12 = vshll.u32 %v3857_v58, 16  ;;  %v2133_v15 = vsel %vm600_vm0, %v2131_v28, %v2132_v29 }
  0xd6   : > { %v3838_v57 = vpop.permute.xlu2 %1388  ;;  %v369_v46 = vpack.c.b16 %v353_v23, %v353_v23  ;;  %v1220_v11 = vshll.u32 %v3860_v1, 16  ;;  %v2121_v10 = vsel %vm600_vm0, %v2119_v17, %v2120_v3 }
  0xd7   : > { %v501_v31 = vrot.slane %v499_v12, 1 }
  0xd8   : > { %667 = vrot.lane.b32.xlu1 %v630_v6, %s3199_s20  ;;  %v2990_v6 = vld [vmem:[%s3245_s19 + $0xc8] sm:$0x1]  ;;  %v504_v56 = vshll.u32 %v369_v46, 16  ;;  %v632_v51 = vrot.slane %v369_v46, 1 }
  0xd9   : > { %586 = vrot.lane.b32.xlu0 %v495_v5, %s3200_s21  ;;  %v1850_v40 = vunpack.c.l.b16 %v2990_v6 }
  0xda   : > { %v2147_v48 = vpop.permute.xlu1 %2146  ;;  %v506_v43 = vrot.slane %v504_v56, 1  ;;  %v633_v3 = vsel %vm600_vm0, %v631_v37, %v632_v51  ;;  %v3169_v56 = vld [vmem:[%s3245_s19 + $0x3c] sm:$0xff] }
  0xdb   : > { %v680_v13 = vpop.permute.xlu0 %679  ;;  %v2211_v49 = vsel %vm714_vm4, %v2179_v0, %v2147_v48  ;;  %v2035_v0 = vsel %vm375_vm1, %v2030_v9, %v2034_v7  ;;  %v497_v48 = vshrl.u32 %v3857_v58, 16  ;;  %v2037_v9 = vshrl.u32 %v3885_v55, 16  ;;  %v3911_v7 = vld [vmem:[%s3245_s19 + $0x84] sm:$0xff] }
  0xdc   : > { %v746_v33 = vsel %vm714_vm4, %v713_v18, %v680_v13  ;;  %3067 = vmatmul.msk.bf16.gmra.mxu2 %vm754_vm5, %v2211_v49  ;;  %1302 = vrot.lane.b32.xlu2 %v1211_v34, %s3200_s21  ;;  %v1218_v18 = vor.u32 %v1217_v25, %v1213_v14  ;;  %v1222_v13 = vrot.slane %v1220_v11, 1  ;;  %v3896_v49 = vpack.c.b16 %v1850_v40, %v1850_v40 }
  0xdd   : > { %2811 = vmatmul.msk.bf16.gmra.mxu3 %vm754_vm5, %v746_v33  ;;  %v2039_v33 = vshll.u32 %v3885_v55, 16  ;;  %v502_v54 = vor.u32 %v501_v31, %v497_v48  ;;  %v3168_v48 = vld [vmem:[%s3245_s19 + $0x48] sm:$0xff] }
  0xde   : > { %v3872_v50 = vpop.permute.xlu2 %659  ;;  %v1223_v6 = vsel %vm375_vm1, %v1218_v18, %v1222_v13  ;;  %v509_v18 = vshrl.u32 %v3911_v7, 16  ;;  %v2847_v13 = vld [vmem:[%s3245_s19 + $0x98] sm:$0x1] }
  0xdf   : > { %v507_v17 = vsel %vm375_vm1, %v502_v54, %v506_v43 }
  0xe0   : > { %2078 = vrot.lane.b32.xlu1 %v1987_v32, %s3200_s21  ;;  %v234_v32 = vld [vmem:[%s3245_s19 + $0x8c] sm:$0x1] }
  0xe1   : > { %1382 = vrot.lane.b32.xlu0 %v1345_v22, %s3199_s20  ;;  %v1991_v22 = vshll.u32 %v3891_v4, 16  ;;  %v354_v12 = vunpack.c.l.b16 %v234_v32 }
  0xe2   : > { %v1293_v16 = vpop.permute.xlu1 %1292 }
  0xe3   : > { %v1405_v5 = vsel %vm681_vm3, %v3166_v24, %v1293_v16  ;;  %v658_v42 = vpop.permute.xlu0 %657  ;;  %v2041_v16 = vrot.slane %v2039_v33, 1  ;;  %v1989_v24 = vshrl.u32 %v3891_v4, 16  ;;  %v3922_v14 = vpack.c.b16 %v354_v12, %v354_v12 }
  0xe4   : > { %v724_v8 = vsel %vm714_vm4, %v691_v44, %v658_v42  ;;  %v1437_v47 = vsel %vm714_vm4, %v1405_v5, %v3812_v19  ;;  %v1846_v19 = vunpack.c.l.b16 %v2978_v53  ;;  %2086 = vrot.lane.b32.xlu2 %v2035_v0, %s3200_s21  ;;  %v1993_v5 = vrot.slane %v1991_v22, 1 }
  0xe5   : > { %2800 = vmatmul.msk.bf16.gmra.mxu0 %vm754_vm5, %v724_v8  ;;  %2934 = vmatmul.msk.bf16.gmra.mxu1 %vm754_vm5, %v1437_v47  ;;  %v2042_v25 = vor.u32 %v2041_v16, %v2037_v9  ;;  %v1346_v53 = vrot.slane %v3844_v30, 1  ;;  %v1347_v8 = vrot.slane %v3860_v1, 1  ;;  %v516_v54 = vshll.u32 %v3922_v14, 16 }
  0xe6   : > { %v3901_v45 = vpack.c.b16 %v1846_v19, %v1846_v19  ;;  %v3904_v28 = vpop.permute.xlu2 %1310  ;;  %v1994_v11 = vor.u32 %v1993_v5, %v1989_v24  ;;  %v1071_v22 = vunpack.c.l.b16 %v2847_v13  ;;  %v2134_v12 = vrot.slane %v3885_v55, 1  ;;  %v3170_v24 = vld [vmem:[%s3245_s19 + $0x48] sm:$0xff] }
  0xe7   : > { %v1348_v37 = vsel %vm600_vm0, %v1346_v53, %v1347_v8 }
  0xe8   : > { %2166 = vrot.lane.b32.xlu1 %v2133_v15, %s3199_s20  ;;  %v2044_v15 = vshll.u32 %v3896_v49, 16  ;;  %v1996_v42 = vshll.u32 %v3901_v45, 16  ;;  %v1087_v16 = vpack.c.b16 %v1071_v22, %v1071_v22 }
  0xe9   : > { %2158 = vrot.lane.b32.xlu0 %v2121_v10, %s3199_s20 }
  0xea   : > { %v2069_v34 = vpop.permute.xlu1 %2068  ;;  %v2046_v46 = vrot.slane %v2044_v15, 1  ;;  %v1998_v40 = vrot.slane %v1996_v42, 1  ;;  %v1232_v8 = vshll.u32 %v1087_v16, 16 }
  0xeb   : > { %v1309_v29 = vpop.permute.xlu0 %1308  ;;  %v2181_v31 = vsel %vm681_vm3, %v3168_v48, %v2069_v34  ;;  %v3945_v34 = vld [vmem:[%s3245_s19 + $0x90] sm:$0xff] }
  0xec   : > { %v1421_v23 = vsel %vm681_vm3, %v3167_v41, %v1309_v29  ;;  %588 = vrot.lane.b32.xlu2 %v507_v17, %s3200_s21  ;;  %v2047_v43 = vsel %vm375_vm1, %v2042_v25, %v2046_v46  ;;  %v1999_v51 = vsel %vm375_vm1, %v1994_v11, %v1998_v40  ;;  %v518_v29 = vrot.slane %v516_v54, 1  ;;  %v3973_v40 = vld [vmem:[%s3245_s19 + $0x9c] sm:$0xff] }
  0xed   : > { %v1453_v44 = vsel %vm714_vm4, %v1421_v23, %v3838_v57  ;;  %v511_v57 = vshll.u32 %v3911_v7, 16  ;;  %v1227_v41 = vshll.u32 %v3945_v34, 16  ;;  %v2122_v23 = vrot.slane %v3891_v4, 1 }
  0xee   : > { %2942 = vmatmul.msk.bf16.vlgmr.msrb.gmra.mxu3 %vm754_vm5, %v1453_v44  ;;  %v3929_v0 = vpop.permute.xlu2 %2150  ;;  %v2135_v44 = vrot.slane %v3896_v49, 1  ;;  %v1225_v25 = vshrl.u32 %v3945_v34, 16  ;;  %v2003_v13 = vshll.u32 %v3973_v40, 16 }
  0xef   : > { %v513_v32 = vrot.slane %v511_v57, 1  ;;  %v2981_v57 = vld [vmem:[%s3245_s19 + $0xa4] sm:$0x1]  ;;  %v1229_v46 = vrot.slane %v1227_v41, 1 }
  0xf0   : > { %1304 = vrot.lane.b32.xlu1 %v1223_v6, %s3200_s21  ;;  %v2123_v6 = vrot.slane %v3901_v45, 1  ;;  %v2136_v53 = vsel %vm600_vm0, %v2134_v12, %v2135_v44  ;;  %v1847_v48 = vunpack.c.l.b16 %v2981_v57 }
  0xf1   : > { %669 = vrot.lane.b32.xlu0 %v633_v3, %s3199_s20  ;;  %v2993_v3 = vld [vmem:[%s3245_s19 + $0xd4] sm:$0x1] }
  0xf2   : > { %v579_v47 = vpop.permute.xlu1 %578  ;;  %v2124_v49 = vsel %vm600_vm0, %v2122_v23, %v2123_v6  ;;  %v1851_v11 = vunpack.c.l.b16 %v2993_v3  ;;  %v2005_v6 = vrot.slane %v2003_v13, 1 }
  0xf3   : > { %v693_v10 = vsel %vm681_vm3, %v3169_v56, %v579_v47  ;;  %v2149_v19 = vpop.permute.xlu0 %2148  ;;  %v3970_v47 = vld [vmem:[%s3245_s19 + $0xcc] sm:$0xff]  ;;  %v1350_v56 = vrot.slane %v1087_v16, 1 }
  0xf4   : > { %v2213_v33 = vsel %vm714_vm4, %v2181_v31, %v2149_v19  ;;  %v726_v1 = vsel %vm714_vm4, %v693_v10, %v3872_v50  ;;  %v514_v50 = vor.u32 %v513_v32, %v509_v18  ;;  %1384 = vrot.lane.b32.xlu2 %v1348_v37, %s3199_s20  ;;  %v1349_v31 = vrot.slane %v3945_v34, 1 }
  0xf5   : > { %3068 = vmatmul.msk.bf16.gmra.mxu2 %vm754_vm5, %v2213_v33  ;;  %2801 = vmatmul.msk.bf16.gmra.mxu0 %vm754_vm5, %v726_v1  ;;  %v634_v10 = vrot.slane %v3911_v7, 1  ;;  %v635_v19 = vrot.slane %v3922_v14, 1  ;;  %v1230_v18 = vor.u32 %v1229_v46, %v1225_v25  ;;  %v1423_v33 = vsel %vm681_vm3, %v3529_v59, %v3904_v28  ;;  %v3171_v14 = vld [vmem:[%s3245_s19 + $0x54] sm:$0xff] }
  0xf6   : > { %v3957_v15 = vpop.permute.xlu2 %1296  ;;  %v519_v42 = vsel %vm375_vm1, %v514_v50, %v518_v29  ;;  %v1234_v32 = vrot.slane %v1232_v8, 1  ;;  %v1867_v54 = vpack.c.b16 %v1851_v11, %v1851_v11  ;;  %v1863_v50 = vpack.c.b16 %v1847_v48, %v1847_v48 }
  0xf7   : > { %v1351_v41 = vsel %vm600_vm0, %v1349_v31, %v1350_v56  ;;  %v636_v23 = vsel %vm600_vm0, %v634_v10, %v635_v19  ;;  %v2001_v28 = vshrl.u32 %v3973_v40, 16  ;;  %v2049_v44 = vshrl.u32 %v3970_v47, 16 }
  0xf8   : > { %2088 = vrot.lane.b32.xlu1 %v2047_v43, %s3200_s21  ;;  %v2051_v43 = vshll.u32 %v3970_v47, 16  ;;  %v1235_v12 = vsel %vm375_vm1, %v1230_v18, %v1234_v32  ;;  %v2126_v3 = vrot.slane %v1863_v50, 1  ;;  %v2137_v56 = vrot.slane %v3970_v47, 1 }
  0xf9   : > { %2080 = vrot.lane.b32.xlu0 %v1999_v51, %s3200_s21  ;;  %v2138_v10 = vrot.slane %v1867_v54, 1  ;;  %v1409_v13 = vsel %vm681_vm3, %v3567_v62, %v3957_v15 }
  0xfa   : > { %v1375_v9 = vpop.permute.xlu1 %1374  ;;  %v2053_v16 = vrot.slane %v2051_v43, 1 }
  0xfb   : > { %v1295_v17 = vpop.permute.xlu0 %1294  ;;  %v2139_v32 = vsel %vm600_vm0, %v2137_v56, %v2138_v10 }
  0xfc   : > { %v1407_v5 = vsel %vm681_vm3, %v3170_v24, %v1295_v17  ;;  %2160 = vrot.lane.b32.xlu2 %v2124_v49, %s3199_s20  ;;  %v2056_v17 = vshll.u32 %v1867_v54, 16  ;;  %v2006_v24 = vor.u32 %v2005_v6, %v2001_v28  ;;  %v2054_v57 = vor.u32 %v2053_v16, %v2049_v44  ;;  %v3172_v49 = vld [vmem:[%s3245_s19 + $0x48] sm:$0xff] }
  0xfd   : > { %v1439_v45 = vsel %vm714_vm4, %v1407_v5, %v1375_v9  ;;  %v2008_v9 = vshll.u32 %v1863_v50, 16  ;;  %v3173_v50 = vld [vmem:[%s3245_s19 + $0xb4] sm:$0xff] }
  0xfe   : > { %2935 = vmatmul.msk.bf16.gmra.mxu1 %vm754_vm5, %v1439_v45  ;;  %v2073_v37 = vpop.permute.xlu2 %2072  ;;  %v2058_v45 = vrot.slane %v2056_v17, 1 }
  0xff   : > { %v2010_v5 = vrot.slane %v2008_v9, 1  ;;  %v2185_v54 = vsel %vm681_vm3, %v3598_v35, %v2073_v37 }
 0x100   : > { %590 = vrot.lane.b32.xlu1 %v519_v42, %s3200_s21  ;;  %v2059_v31 = vsel %vm375_vm1, %v2054_v57, %v2058_v45 }
 0x101   : > { %2168 = vrot.lane.b32.xlu0 %v2136_v53, %s3199_s20  ;;  %v2011_v48 = vsel %vm375_vm1, %v2006_v24, %v2010_v5 }
 0x102   : > { %v1391_v1 = vpop.permute.xlu1 %1390 }
 0x103   : > { %v2071_v51 = vpop.permute.xlu0 %2070  ;;  %v1455_v22 = vsel %vm714_vm4, %v1423_v33, %v1391_v1 }
 0x104   : > { %v2183_v29 = vsel %vm681_vm3, %v3171_v14, %v2071_v51  ;;  %2943 = vmatmul.msk.bf16.gmra.mxu3 %vm754_vm5, %v1455_v22  ;;  %671 = vrot.lane.b32.xlu2 %v636_v23, %s3199_s20 }
 0x105   : > { %v2215_v59 = vsel %vm714_vm4, %v2183_v29, %v3929_v0  ;;  %v2125_v0 = vrot.slane %v3973_v40, 1 }
 0x106   : > { %3069 = vmatmul.msk.bf16.gmra.mxu2 %vm754_vm5, %v2215_v59  ;;  %v583_v25 = vpop.permute.xlu2 %582 }
 0x107   : > { %v2127_v11 = vsel %vm600_vm0, %v2125_v0, %v2126_v3  ;;  %v697_v6 = vsel %vm681_vm3, %v3630_v20, %v583_v25 }
 0x108   : > { %1386 = vrot.lane.b32.xlu1 %v1351_v41, %s3199_s20 }
 0x109   : > { %1306 = vrot.lane.b32.xlu0 %v1235_v12, %s3200_s21 }
 0x10a   : > { %v662_v42 = vpop.permute.xlu1 %661 }
 0x10b   : > { %v581_v46 = vpop.permute.xlu0 %580 }
 0x10c   : > { %v695_v53 = vsel %vm681_vm3, %v3172_v49, %v581_v46  ;;  %2082 = vrot.lane.b32.xlu2 %v2011_v48, %s3200_s21 }
 0x10d   : > { %v728_v8 = vsel %vm714_vm4, %v695_v53, %v662_v42 }
 0x10e   : > { %2802 = vmatmul.msk.bf16.gmra.mxu0 %vm754_vm5, %v728_v8  ;;  %v1379_v18 = vpop.permute.xlu2 %1378 }
 0x110   : > { %2162 = vrot.lane.b32.xlu1 %v2127_v11, %s3199_s20 }
 0x111   : > { %2090 = vrot.lane.b32.xlu0 %v2059_v31, %s3200_s21 }
 0x112   : > { %v1313_v19 = vpop.permute.xlu1 %1312 }
 0x113   : > { %v1377_v33 = vpop.permute.xlu0 %1376  ;;  %v1425_v62 = vsel %vm681_vm3, %v3173_v50, %v1313_v19 }
 0x114   : > { %v1441_v1 = vsel %vm714_vm4, %v1409_v13, %v1377_v33  ;;  %2170 = vrot.lane.b32.xlu2 %v2139_v32, %s3199_s20  ;;  %v4056_v13 = vld [vmem:[%s4324_s2] ss:$0 sm:$0xff] }
 0x115   : > { %2936 = vmatmul.msk.bf16.gmra.mxu1 %vm754_vm5, %v1441_v1 }
 0x116   : > { %v1395_v23 = vpop.permute.xlu2 %1394 }
 0x117   : > { %v2288_v24 = vpop.f32.mrf.mxu2 }
 0x118   : > { %v860_v43 = vpop.f32.mrf.mxu3 }
 0x119   : > { %904 = vst.msk [vmem:[#allocation2 + $0xc0] sm:$0xff] %vm714_vm4, %v860_v43 }
 0x11a   : > { %v1512_v51 = vpop.f32.mrf.mxu1  ;;  %v2153_v22 = vpop.permute.xlu1 %2152 }
 0x11b   : > { %v800_v15 = vpop.f32.mrf.mxu0  ;;  %v1393_v14 = vpop.permute.xlu0 %1392  ;;  %v2217_v29 = vsel %vm714_vm4, %v2185_v54, %v2153_v22 }
 0x11c   : > { %880 = vst.msk [vmem:[#allocation2] sm:$0xff] %vm714_vm4, %v800_v15  ;;  %v1457_v41 = vsel %vm714_vm4, %v1425_v62, %v1393_v14  ;;  %3070 = vmatmul.msk.bf16.gmra.mxu2 %vm754_vm5, %v2217_v29 }
 0x11d   : > { %2944 = vmatmul.msk.bf16.gmra.mxu3 %vm754_vm5, %v1457_v41 }
 0x11e   : > { %v666_v3 = vpop.permute.xlu2 %665 }
 0x11f   : > { %v2290_v11 = vpop.f32.mrf.mxu2 }
 0x120   : > { %v862_v59 = vpop.f32.mrf.mxu3 }
 0x121   : > { %905 = vst.msk [vmem:[#allocation2 + $0xc8] sm:$0xff] %vm714_vm4, %v862_v59 }
 0x122   : > { %v1514_v35 = vpop.f32.mrf.mxu1  ;;  %v1299_v37 = vpop.permute.xlu1 %1298 }
 0x123   : > { %v1592_v28 = vld [vmem:[#allocation2] sm:$0xff]  ;;  %v1411_v9 = vsel %vm681_vm3, %v3611_v61, %v1299_v37  ;;  %v802_v12 = vpop.f32.mrf.mxu0  ;;  %v664_v44 = vpop.permute.xlu0 %663 }
 0x124   : > { %v1624_v16 = vadd.f32 %v1592_v28, %v1512_v51  ;;  %881 = vst.msk [vmem:[#allocation2 + $0x8] sm:$0xff] %vm714_vm4, %v802_v12  ;;  %v730_v17 = vsel %vm714_vm4, %v697_v6, %v664_v44  ;;  %v1443_v0 = vsel %vm714_vm4, %v1411_v9, %v1379_v18 }
 0x125   : > { %2803 = vmatmul.msk.bf16.gmra.mxu0 %vm754_vm5, %v730_v17  ;;  %2937 = vmatmul.msk.bf16.gmra.mxu1 %vm754_vm5, %v1443_v0 }
 0x126   : > { %1656 = vst.msk [vmem:[#allocation2] sm:$0xff] %vm714_vm4, %v1624_v16  ;;  %v2077_v46 = vpop.permute.xlu2 %2076 }
 0x12a   : > { %v2075_v20 = vpop.permute.xlu1 %2074  ;;  %v1517_v45 = vpop.f32.mrf.mxu1 }
 0x12b   : > { %v1593_v5 = vld [vmem:[#allocation2 + $0x8] sm:$0xff]  ;;  %v805_v61 = vpop.f32.mrf.mxu0  ;;  %v1315_v42 = vpop.permute.xlu0 %1314  ;;  %v2187_v56 = vsel %vm681_vm3, %v3647_v39, %v2075_v20 }
 0x12c   : > { %v1625_v57 = vadd.f32 %v1593_v5, %v1514_v35  ;;  %882 = vst.msk [vmem:[#allocation2 + $0x10] sm:$0xff] %vm714_vm4, %v805_v61  ;;  %v1427_v25 = vsel %vm681_vm3, %v3653_v26, %v1315_v42 }
 0x12d   : > { %v2368_v49 = vld [vmem:[#allocation2] sm:$0xff]  ;;  %v1459_v53 = vsel %vm714_vm4, %v1427_v25, %v1395_v23 }
 0x12e   : > { %v2400_v8 = vadd.f32 %v2368_v49, %v2288_v24  ;;  %1657 = vst.msk [vmem:[#allocation2 + $0x8] sm:$0xff] %vm714_vm4, %v1625_v57  ;;  %2945 = vmatmul.msk.bf16.gmra.mxu3 %vm754_vm5, %v1459_v53  ;;  %v2165_v39 = vpop.permute.xlu2 %2164 }
 0x130   : > { %2432 = vst.msk [vmem:[#allocation2] sm:$0xff] %vm714_vm4, %v2400_v8 }
 0x131   : > { %v865_v48 = vpop.f32.mrf.mxu3 }
 0x132   : > { %906 = vst.msk [vmem:[#allocation2 + $0xd0] sm:$0xff] %vm714_vm4, %v865_v48  ;;  %v585_v31 = vpop.permute.xlu1 %584  ;;  %v1519_v54 = vpop.f32.mrf.mxu1 }
 0x133   : > { %v1594_v26 = vld [vmem:[#allocation2 + $0x10] sm:$0xff]  ;;  %v699_v10 = vsel %vm681_vm3, %v3685_v63, %v585_v31  ;;  %v807_v19 = vpop.f32.mrf.mxu0  ;;  %v2155_v18 = vpop.permute.xlu0 %2154 }
 0x134   : > { %v1626_v33 = vadd.f32 %v1594_v26, %v1517_v45  ;;  %883 = vst.msk [vmem:[#allocation2 + $0x18] sm:$0xff] %vm714_vm4, %v807_v19  ;;  %v2219_v1 = vsel %vm714_vm4, %v2187_v56, %v2155_v18  ;;  %v732_v32 = vsel %vm714_vm4, %v699_v10, %v666_v3 }
 0x135   : > { %v2369_v43 = vld [vmem:[#allocation2 + $0x8] sm:$0xff]  ;;  %3071 = vmatmul.msk.bf16.gmra.mxu2 %vm754_vm5, %v2219_v1  ;;  %2804 = vmatmul.msk.bf16.gmra.mxu0 %vm754_vm5, %v732_v32 }
 0x136   : > { %v2401_v63 = vadd.f32 %v2369_v43, %v2290_v11  ;;  %1658 = vst.msk [vmem:[#allocation2 + $0x10] sm:$0xff] %vm714_vm4, %v1626_v33  ;;  %v4076_v6 = vpop.permute.xlu2 %1302 }
 0x137   : > { %v2464_v51 = vld [vmem:[#allocation2] sm:$0xff] }
 0x138   : > { %v2500_v22 = vadd.f32 %v4056_v13, %v2464_v51  ;;  %2433 = vst.msk [vmem:[#allocation2 + $0x8] sm:$0xff] %vm714_vm4, %v2401_v63  ;;  %v2293_v50 = vpop.f32.mrf.mxu2 }
 0x139   : > { %v867_v62 = vpop.f32.mrf.mxu3 }
 0x13a   : > { %v2532_v15 = vmax.f32 %v2500_v22, 0.0  ;;  %907 = vst.msk [vmem:[#allocation2 + $0xd8] sm:$0xff] %vm714_vm4, %v867_v62  ;;  %v1381_v14 = vpop.permute.xlu1 %1380 }
 0x13b   : > { %v1595_v29 = vld [vmem:[#allocation2 + $0x18] sm:$0xff]  ;;  %v810_v41 = vpop.f32.mrf.mxu0  ;;  %v1301_v35 = vpop.permute.xlu0 %1300 }
 0x13c   : > { %v2564_v23 = vpack.c.bf16 %v2532_v15, %v2532_v15  ;;  %v1627_v59 = vadd.f32 %v1595_v29, %v1519_v54  ;;  %884 = vst.msk [vmem:[#allocation2 + $0x20] sm:$0xff] %vm714_vm4, %v810_v41  ;;  %v1413_v28 = vsel %vm681_vm3, %v3709_v38, %v1301_v35  ;;  %v1522_v17 = vpop.f32.mrf.mxu1  ;;  %v2189_v38 = vsel %vm681_vm3, %v3746_v27, %v2077_v46 }
 0x13d   : > { %v2370_v37 = vld [vmem:[#allocation2 + $0x10] sm:$0xff]  ;;  %v1445_v12 = vsel %vm714_vm4, %v1413_v28, %v1381_v14  ;;  %v1415_v41 = vsel %vm681_vm3, %v3801_v36, %v4076_v6 }
 0x13e   : > { %2597 = vst.msk [vmem:[%s4071_s16] sm:$0xf] %vm2596_vm6, %v2564_v23  ;;  %v2402_v9 = vadd.f32 %v2370_v37, %v2293_v50  ;;  %2938 = vmatmul.msk.bf16.gmra.mxu1 %vm754_vm5, %v1445_v12  ;;  %v2087_v11 = vpop.permute.xlu2 %2086 }
 0x13f   : > { %v2465_v44 = vld [vmem:[#allocation2 + $0x8] sm:$0xff]  ;;  %1659 = vst.msk [vmem:[#allocation2 + $0x18] sm:$0xff] %vm714_vm4, %v1627_v59  ;;  %v2199_v36 = vsel %vm681_vm3, %v3827_v2, %v2087_v11 }
 0x140   : > { %v2501_v16 = vadd.f32 %v4056_v13, %v2465_v44  ;;  %2434 = vst.msk [vmem:[#allocation2 + $0x10] sm:$0xff] %vm714_vm4, %v2402_v9  ;;  %v2295_v3 = vpop.f32.mrf.mxu2 }
 0x142   : > { %v2533_v0 = vmax.f32 %v2501_v16, 0.0  ;;  %v2157_v24 = vpop.permute.xlu1 %2156 }
 0x143   : > { %v1596_v20 = vld [vmem:[#allocation2 + $0x20] sm:$0xff]  ;;  %v812_v5 = vpop.f32.mrf.mxu0  ;;  %v2221_v61 = vsel %vm714_vm4, %v2189_v38, %v2157_v24  ;;  %v2085_v45 = vpop.permute.xlu0 %2084 }
 0x144   : > { %v2565_v42 = vpack.c.bf16 %v2533_v0, %v2533_v0  ;;  %v1628_v57 = vadd.f32 %v1596_v20, %v1522_v17  ;;  %885 = vst.msk [vmem:[#allocation2 + $0x28] sm:$0xff] %vm714_vm4, %v812_v5  ;;  %v2197_v25 = vsel %vm681_vm3, %v3742_v60, %v2085_v45  ;;  %v1524_v31 = vpop.f32.mrf.mxu1 }
 0x145   : > { %3072 = vmatmul.msk.bf16.gmra.mxu2 %vm754_vm5, %v2221_v61  ;;  %v2229_v27 = vsel %vm714_vm4, %v2197_v25, %v2165_v39 }
 0x146   : > { %2598 = vst.msk [vmem:[%s4071_s16 + $0x4] sm:$0xf] %vm2596_vm6, %v2565_v42  ;;  %v2371_v49 = vld [vmem:[#allocation2 + $0x18] sm:$0xff]  ;;  %3076 = vmatmul.msk.bf16.vlgmr.msra.gmra.mxu3 %vm754_vm5, %v2229_v27  ;;  %v589_v50 = vpop.permute.xlu2 %588 }
 0x147   : > { %v2466_v46 = vld [vmem:[#allocation2 + $0x10] sm:$0xff]  ;;  %1660 = vst.msk [vmem:[#allocation2 + $0x20] sm:$0xff] %vm714_vm4, %v1628_v57  ;;  %v2403_v53 = vadd.f32 %v2371_v49, %v2295_v3  ;;  %v870_v8 = vpop.f32.mrf.mxu3 }
 0x148   : > { %v2502_v48 = vadd.f32 %v4056_v13, %v2466_v46  ;;  %908 = vst.msk [vmem:[#allocation2 + $0xe0] sm:$0xff] %vm714_vm4, %v870_v8 }
 0x149   : > { %2435 = vst.msk [vmem:[#allocation2 + $0x18] sm:$0xff] %vm714_vm4, %v2403_v53  ;;  %v2298_v33 = vpop.f32.mrf.mxu2 }
 0x14a   : > { %v2534_v60 = vmax.f32 %v2502_v48, 0.0  ;;  %v668_v56 = vpop.permute.xlu1 %667  ;;  %v703_v48 = vsel %vm681_vm3, %v3857_v58, %v589_v50 }
 0x14b   : > { %v1597_v26 = vld [vmem:[#allocation2 + $0x28] sm:$0xff]  ;;  %v815_v10 = vpop.f32.mrf.mxu0  ;;  %v587_v1 = vpop.permute.xlu0 %586 }
 0x14c   : > { %v2566_v19 = vpack.c.bf16 %v2534_v60, %v2534_v60  ;;  %v1629_v18 = vadd.f32 %v1597_v26, %v1524_v31  ;;  %886 = vst.msk [vmem:[#allocation2 + $0x30] sm:$0xff] %vm714_vm4, %v815_v10  ;;  %v701_v32 = vsel %vm681_vm3, %v3777_v21, %v587_v1 }
 0x14d   : > { %v734_v43 = vsel %vm714_vm4, %v701_v32, %v668_v56 }
 0x14e   : > { %2599 = vst.msk [vmem:[%s4071_s16 + $0x8] sm:$0xf] %vm2596_vm6, %v2566_v19  ;;  %v2372_v39 = vld [vmem:[#allocation2 + $0x20] sm:$0xff]  ;;  %2805 = vmatmul.msk.bf16.gmra.mxu0 %vm754_vm5, %v734_v43  ;;  %v1385_v24 = vpop.permute.xlu2 %1384 }
 0x14f   : > { %1661 = vst.msk [vmem:[#allocation2 + $0x28] sm:$0xff] %vm714_vm4, %v1629_v18  ;;  %v2404_v63 = vadd.f32 %v2372_v39, %v2298_v33  ;;  %v872_v54 = vpop.f32.mrf.mxu3 }
 0x150   : > { %v2467_v51 = vld [vmem:[#allocation2 + $0x18] sm:$0xff]  ;;  %909 = vst.msk [vmem:[#allocation2 + $0xe8] sm:$0xff] %vm714_vm4, %v872_v54 }
 0x151   : > { %v2503_v22 = vadd.f32 %v4056_v13, %v2467_v51  ;;  %2436 = vst.msk [vmem:[#allocation2 + $0x20] sm:$0xff] %vm714_vm4, %v2404_v63  ;;  %v2300_v28 = vpop.f32.mrf.mxu2 }
 0x152   : > { %v1527_v21 = vpop.f32.mrf.mxu1  ;;  %v2079_v62 = vpop.permute.xlu1 %2078 }
 0x153   : > { %v2535_v15 = vmax.f32 %v2503_v22, 0.0  ;;  %v1598_v14 = vld [vmem:[#allocation2 + $0x30] sm:$0xff]  ;;  %v817_v29 = vpop.f32.mrf.mxu0  ;;  %v1383_v59 = vpop.permute.xlu0 %1382  ;;  %v2191_v20 = vsel %vm681_vm3, %v3790_v52, %v2079_v62 }
 0x154   : > { %v1630_v23 = vadd.f32 %v1598_v14, %v1527_v21  ;;  %887 = vst.msk [vmem:[#allocation2 + $0x38] sm:$0xff] %vm714_vm4, %v817_v29  ;;  %v1447_v37 = vsel %vm714_vm4, %v1415_v41, %v1383_v59 }
 0x155   : > { %v2567_v35 = vpack.c.bf16 %v2535_v15, %v2535_v15  ;;  %2939 = vmatmul.msk.bf16.gmra.mxu1 %vm754_vm5, %v1447_v37 }
 0x156   : > { %v2373_v9 = vld [vmem:[#allocation2 + $0x28] sm:$0xff]  ;;  %1662 = vst.msk [vmem:[#allocation2 + $0x30] sm:$0xff] %vm714_vm4, %v1630_v23  ;;  %v2161_v10 = vpop.permute.xlu2 %2160  ;;  %v1616_v23 = vld [vmem:[#allocation2 + $0xc0] sm:$0xff] }
 0x157   : > { %2600 = vst.msk [vmem:[%s4071_s16 + $0xc] sm:$0xf] %vm2596_vm6, %v2567_v35  ;;  %v2405_v12 = vadd.f32 %v2373_v9, %v2300_v28 }
 0x158   : > { %v2468_v44 = vld [vmem:[#allocation2 + $0x20] sm:$0xff] }
 0x159   : > { %v2504_v16 = vadd.f32 %v4056_v13, %v2468_v44  ;;  %2437 = vst.msk [vmem:[#allocation2 + $0x28] sm:$0xff] %vm714_vm4, %v2405_v12 }
 0x15a   : > { %v1529_v6 = vpop.f32.mrf.mxu1  ;;  %v2167_v17 = vpop.permute.xlu1 %2166 }
 0x15b   : > { %v2536_v0 = vmax.f32 %v2504_v16, 0.0  ;;  %v1599_v38 = vld [vmem:[#allocation2 + $0x38] sm:$0xff]  ;;  %v2231_v3 = vsel %vm714_vm4, %v2199_v36, %v2167_v17  ;;  %v2159_v61 = vpop.permute.xlu0 %2158 }
 0x15c   : > { %v1631_v5 = vadd.f32 %v1599_v38, %v1529_v6  ;;  %3077 = vmatmul.msk.bf16.gmra.mxu3 %vm754_vm5, %v2231_v3  ;;  %v2223_v57 = vsel %vm714_vm4, %v2191_v20, %v2159_v61 }
 0x15d   : > { %v2568_v42 = vpack.c.bf16 %v2536_v0, %v2536_v0  ;;  %3073 = vmatmul.msk.bf16.gmra.mxu2 %vm754_vm5, %v2223_v57  ;;  %v2374_v45 = vld [vmem:[#allocation2 + $0x30] sm:$0xff] }
 0x15e   : > { %1663 = vst.msk [vmem:[#allocation2 + $0x38] sm:$0xff] %vm714_vm4, %v1631_v5  ;;  %v672_v15 = vpop.permute.xlu2 %671 }
 0x15f   : > { %2601 = vst.msk [vmem:[%s4071_s16 + $0x10] sm:$0xf] %vm2596_vm6, %v2568_v42  ;;  %v2303_v2 = vpop.f32.mrf.mxu2 }
 0x160   : > { %v2469_v25 = vld [vmem:[#allocation2 + $0x28] sm:$0xff]  ;;  %v875_v49 = vpop.f32.mrf.mxu3  ;;  %v2406_v27 = vadd.f32 %v2374_v45, %v2303_v2 }
 0x161   : > { %v2505_v52 = vadd.f32 %v4056_v13, %v2469_v25  ;;  %910 = vst.msk [vmem:[#allocation2 + $0xf0] sm:$0xff] %vm714_vm4, %v875_v49 }
 0x162   : > { %2438 = vst.msk [vmem:[#allocation2 + $0x30] sm:$0xff] %vm714_vm4, %v2406_v27  ;;  %v820_v46 = vpop.f32.mrf.mxu0  ;;  %v1305_v53 = vpop.permute.xlu1 %1304 }
 0x163   : > { %v2537_v8 = vmax.f32 %v2505_v52, 0.0  ;;  %888 = vst.msk [vmem:[#allocation2 + $0x40] sm:$0xff] %vm714_vm4, %v820_v46  ;;  %v1417_v11 = vsel %vm681_vm3, %v3844_v30, %v1305_v53  ;;  %v670_v60 = vpop.permute.xlu0 %669  ;;  %v1532_v19 = vpop.f32.mrf.mxu1 }
 0x164   : > { %v1449_v31 = vsel %vm714_vm4, %v1417_v11, %v1385_v24  ;;  %v736_v26 = vsel %vm714_vm4, %v703_v48, %v670_v60  ;;  %v1617_v24 = vld [vmem:[#allocation2 + $0xc8] sm:$0xff] }
 0x165   : > { %v2569_v56 = vpack.c.bf16 %v2537_v8, %v2537_v8  ;;  %2806 = vmatmul.msk.bf16.gmra.mxu0 %vm754_vm5, %v736_v26  ;;  %2940 = vmatmul.msk.bf16.gmra.mxu1 %vm754_vm5, %v1449_v31  ;;  %v2375_v33 = vld [vmem:[#allocation2 + $0x38] sm:$0xff] }
 0x166   : > { %v2083_v20 = vpop.permute.xlu2 %2082 }
 0x167   : > { %2602 = vst.msk [vmem:[%s4071_s16 + $0x14] sm:$0xf] %vm2596_vm6, %v2569_v56  ;;  %v2305_v18 = vpop.f32.mrf.mxu2  ;;  %v2195_v11 = vsel %vm681_vm3, %v3973_v40, %v2083_v20 }
 0x168   : > { %v877_v30 = vpop.f32.mrf.mxu3  ;;  %v2407_v1 = vadd.f32 %v2375_v33, %v2305_v18 }
 0x169   : > { %v2470_v32 = vld [vmem:[#allocation2 + $0x30] sm:$0xff]  ;;  %911 = vst.msk [vmem:[#allocation2 + $0xf8] sm:$0xff] %vm714_vm4, %v877_v30 }
 0x16a   : > { %v2506_v58 = vadd.f32 %v4056_v13, %v2470_v32  ;;  %v1600_v39 = vld [vmem:[#allocation2 + $0x40] sm:$0xff]  ;;  %2439 = vst.msk [vmem:[#allocation2 + $0x38] sm:$0xff] %vm714_vm4, %v2407_v1  ;;  %v822_v43 = vpop.f32.mrf.mxu0  ;;  %v2089_v63 = vpop.permute.xlu1 %2088  ;;  %v1618_v32 = vld [vmem:[#allocation2 + $0xd0] sm:$0xff] }
 0x16b   : > { %v1632_v54 = vadd.f32 %v1600_v39, %v1532_v19  ;;  %889 = vst.msk [vmem:[#allocation2 + $0x48] sm:$0xff] %vm714_vm4, %v822_v43  ;;  %v2081_v22 = vpop.permute.xlu0 %2080  ;;  %v1534_v29 = vpop.f32.mrf.mxu1  ;;  %v2201_v16 = vsel %vm681_vm3, %v3885_v55, %v2089_v63 }
 0x16c   : > { %v2538_v51 = vmax.f32 %v2506_v58, 0.0  ;;  %v2193_v50 = vsel %vm681_vm3, %v3891_v4, %v2081_v22 }
 0x16d   : > { %1664 = vst.msk [vmem:[#allocation2 + $0x40] sm:$0xff] %vm714_vm4, %v1632_v54  ;;  %v2225_v62 = vsel %vm714_vm4, %v2193_v50, %v2161_v10 }
 0x16e   : > { %v2570_v21 = vpack.c.bf16 %v2538_v51, %v2538_v51  ;;  %3074 = vmatmul.msk.bf16.gmra.mxu2 %vm754_vm5, %v2225_v62  ;;  %v1619_v62 = vld [vmem:[#allocation2 + $0xd8] sm:$0xff] }
 0x170   : > { %2603 = vst.msk [vmem:[%s4071_s16 + $0x18] sm:$0xf] %vm2596_vm6, %v2570_v21 }
 0x171   : > { %v2471_v14 = vld [vmem:[#allocation2 + $0x38] sm:$0xff]  ;;  %v1572_v41 = vpop.f32.mrf.mxu3 }
 0x172   : > { %v2507_v59 = vadd.f32 %v4056_v13, %v2471_v14  ;;  %v1601_v35 = vld [vmem:[#allocation2 + $0x48] sm:$0xff]  ;;  %v1648_v37 = vadd.f32 %v1616_v23, %v1572_v41  ;;  %v591_v28 = vpop.permute.xlu1 %590  ;;  %v825_v9 = vpop.f32.mrf.mxu0 }
 0x173   : > { %v1633_v4 = vadd.f32 %v1601_v35, %v1534_v29  ;;  %v705_v12 = vsel %vm681_vm3, %v3911_v7, %v591_v28  ;;  %890 = vst.msk [vmem:[#allocation2 + $0x50] sm:$0xff] %vm714_vm4, %v825_v9  ;;  %v2169_v36 = vpop.permute.xlu0 %2168 }
 0x174   : > { %v2539_v44 = vmax.f32 %v2507_v59, 0.0  ;;  %1680 = vst.msk [vmem:[#allocation2 + $0xc0] sm:$0xff] %vm714_vm4, %v1648_v37  ;;  %v738_v6 = vsel %vm714_vm4, %v705_v12, %v672_v15  ;;  %v2233_v17 = vsel %vm714_vm4, %v2201_v16, %v2169_v36  ;;  %v2376_v38 = vld [vmem:[#allocation2 + $0x40] sm:$0xff] }
 0x175   : > { %1665 = vst.msk [vmem:[#allocation2 + $0x48] sm:$0xff] %vm714_vm4, %v1633_v4  ;;  %3078 = vmatmul.msk.bf16.gmra.mxu3 %vm754_vm5, %v2233_v17  ;;  %2807 = vmatmul.msk.bf16.gmra.mxu0 %vm754_vm5, %v738_v6 }
 0x176   : > { %v2571_v0 = vpack.c.bf16 %v2539_v44, %v2539_v44 }
 0x178   : > { %2604 = vst.msk [vmem:[%s4071_s16 + $0x1c] sm:$0xf] %vm2596_vm6, %v2571_v0  ;;  %v2308_v7 = vpop.f32.mrf.mxu2 }
 0x179   : > { %v2408_v3 = vadd.f32 %v2376_v38, %v2308_v7  ;;  %v1574_v55 = vpop.f32.mrf.mxu3 }
 0x17a   : > { %v1649_v5 = vadd.f32 %v1617_v24, %v1574_v55  ;;  %v1387_v61 = vpop.permute.xlu1 %1386  ;;  %v827_v42 = vpop.f32.mrf.mxu0  ;;  %v1602_v57 = vld [vmem:[#allocation2 + $0x50] sm:$0xff]  ;;  %v1620_v24 = vld [vmem:[#allocation2 + $0xe0] sm:$0xff] }
 0x17b   : > { %2440 = vst.msk [vmem:[#allocation2 + $0x40] sm:$0xff] %vm714_vm4, %v2408_v3  ;;  %v1537_v2 = vpop.f32.mrf.mxu1  ;;  %v1307_v25 = vpop.permute.xlu0 %1306 }
 0x17c   : > { %1681 = vst.msk [vmem:[#allocation2 + $0xc8] sm:$0xff] %vm714_vm4, %v1649_v5  ;;  %v1634_v45 = vadd.f32 %v1602_v57, %v1537_v2  ;;  %v1419_v49 = vsel %vm681_vm3, %v3945_v34, %v1307_v25  ;;  %v2377_v46 = vld [vmem:[#allocation2 + $0x48] sm:$0xff]  ;;  %v2171_v34 = vpop.permute.xlu2 %2170 }
 0x17d   : > { %891 = vst.msk [vmem:[#allocation2 + $0x58] sm:$0xff] %vm714_vm4, %v827_v42  ;;  %v1451_v27 = vsel %vm714_vm4, %v1419_v49, %v1387_v61 }
 0x17e   : > { %1666 = vst.msk [vmem:[#allocation2 + $0x50] sm:$0xff] %vm714_vm4, %v1634_v45  ;;  %2941 = vmatmul.msk.bf16.gmra.mxu1 %vm754_vm5, %v1451_v27  ;;  %v1621_v45 = vld [vmem:[#allocation2 + $0xe8] sm:$0xff] }
 0x180   : > { %v2310_v52 = vpop.f32.mrf.mxu2 }
 0x181   : > { %v2409_v53 = vadd.f32 %v2377_v46, %v2310_v52 }
 0x182   : > { %v2472_v8 = vld [vmem:[#allocation2 + $0x40] sm:$0xff]  ;;  %v2163_v48 = vpop.permute.xlu1 %2162 }
 0x183   : > { %v2508_v60 = vadd.f32 %v4056_v13, %v2472_v8  ;;  %2441 = vst.msk [vmem:[#allocation2 + $0x48] sm:$0xff] %vm714_vm4, %v2409_v53  ;;  %v1539_v31 = vpop.f32.mrf.mxu1  ;;  %v2227_v56 = vsel %vm714_vm4, %v2195_v11, %v2163_v48  ;;  %v2091_v10 = vpop.permute.xlu0 %2090 }
 0x184   : > { %v1603_v26 = vld [vmem:[#allocation2 + $0x58] sm:$0xff]  ;;  %3075 = vmatmul.msk.bf16.gmra.mxu2 %vm754_vm5, %v2227_v56  ;;  %v2203_v33 = vsel %vm681_vm3, %v3970_v47, %v2091_v10  ;;  %v1622_v56 = vld [vmem:[#allocation2 + $0xf0] sm:$0xff] }
 0x185   : > { %v2540_v19 = vmax.f32 %v2508_v60, 0.0  ;;  %v1635_v18 = vadd.f32 %v1603_v26, %v1539_v31  ;;  %v2235_v40 = vsel %vm714_vm4, %v2203_v33, %v2171_v34  ;;  %v2378_v43 = vld [vmem:[#allocation2 + $0x50] sm:$0xff] }
 0x186   : > { %3079 = vmatmul.msk.bf16.gmra.mxu3 %vm754_vm5, %v2235_v40 }
 0x187   : > { %v2572_v30 = vpack.c.bf16 %v2540_v19, %v2540_v19  ;;  %1667 = vst.msk [vmem:[#allocation2 + $0x58] sm:$0xff] %vm714_vm4, %v1635_v18  ;;  %v1577_v1 = vpop.f32.mrf.mxu3 }
 0x188   : > { %v1650_v58 = vadd.f32 %v1618_v32, %v1577_v1 }
 0x189   : > { %2605 = vst.msk [vmem:[%s4071_s16 + $0x20] sm:$0xf] %vm2596_vm6, %v2572_v30  ;;  %v2313_v39 = vpop.f32.mrf.mxu2 }
 0x18a   : > { %v2473_v63 = vld [vmem:[#allocation2 + $0x48] sm:$0xff]  ;;  %1682 = vst.msk [vmem:[#allocation2 + $0xd0] sm:$0xff] %vm714_vm4, %v1650_v58  ;;  %v2410_v54 = vadd.f32 %v2378_v43, %v2313_v39 }
 0x18b   : > { %v2509_v47 = vadd.f32 %v4056_v13, %v2473_v63  ;;  %v830_v51 = vpop.f32.mrf.mxu0  ;;  %v1623_v63 = vld [vmem:[#allocation2 + $0xf8] sm:$0xff] }
 0x18c   : > { %2442 = vst.msk [vmem:[#allocation2 + $0x50] sm:$0xff] %vm714_vm4, %v2410_v54 }
 0x18d   : > { %v2541_v22 = vmax.f32 %v2509_v47, 0.0  ;;  %892 = vst.msk [vmem:[#allocation2 + $0x60] sm:$0xff] %vm714_vm4, %v830_v51 }
 0x18e   : > { %v2379_v29 = vld [vmem:[#allocation2 + $0x58] sm:$0xff] }
 0x18f   : > { %v2573_v50 = vpack.c.bf16 %v2541_v22, %v2541_v22  ;;  %v1579_v21 = vpop.f32.mrf.mxu3 }
 0x190   : > { %v1651_v15 = vadd.f32 %v1619_v62, %v1579_v21 }
 0x191   : > { %2606 = vst.msk [vmem:[%s4071_s16 + $0x24] sm:$0xf] %vm2596_vm6, %v2573_v50  ;;  %v2315_v14 = vpop.f32.mrf.mxu2 }
 0x192   : > { %1683 = vst.msk [vmem:[#allocation2 + $0xd8] sm:$0xff] %vm714_vm4, %v1651_v15  ;;  %v2411_v41 = vadd.f32 %v2379_v29, %v2315_v14  ;;  %v1542_v23 = vpop.f32.mrf.mxu1 }
 0x193   : > { %v2474_v59 = vld [vmem:[#allocation2 + $0x50] sm:$0xff]  ;;  %v832_v35 = vpop.f32.mrf.mxu0 }
 0x194   : > { %v2510_v37 = vadd.f32 %v4056_v13, %v2474_v59  ;;  %2443 = vst.msk [vmem:[#allocation2 + $0x58] sm:$0xff] %vm714_vm4, %v2411_v41  ;;  %v1604_v28 = vld [vmem:[#allocation2 + $0x60] sm:$0xff] }
 0x195   : > { %v1636_v9 = vadd.f32 %v1604_v28, %v1542_v23  ;;  %893 = vst.msk [vmem:[#allocation2 + $0x68] sm:$0xff] %vm714_vm4, %v832_v35 }
 0x196   : > { %v2542_v4 = vmax.f32 %v2510_v37, 0.0 }
 0x197   : > { %1668 = vst.msk [vmem:[#allocation2 + $0x60] sm:$0xff] %vm714_vm4, %v1636_v9 }
 0x198   : > { %v2574_v12 = vpack.c.bf16 %v2542_v4, %v2542_v4 }
 0x19a   : > { %2607 = vst.msk [vmem:[%s4071_s16 + $0x28] sm:$0xf] %vm2596_vm6, %v2574_v12  ;;  %v1544_v44 = vpop.f32.mrf.mxu1 }
 0x19b   : > { %v2475_v16 = vld [vmem:[#allocation2 + $0x58] sm:$0xff] }
 0x19c   : > { %v2511_v36 = vadd.f32 %v4056_v13, %v2475_v16  ;;  %v1605_v6 = vld [vmem:[#allocation2 + $0x68] sm:$0xff]  ;;  %v2392_v16 = vld [vmem:[#allocation2 + $0xc0] sm:$0xff] }
 0x19d   : > { %v1637_v17 = vadd.f32 %v1605_v6, %v1544_v44 }
 0x19e   : > { %v2543_v0 = vmax.f32 %v2511_v36, 0.0  ;;  %v2380_v38 = vld [vmem:[#allocation2 + $0x60] sm:$0xff] }
 0x19f   : > { %1669 = vst.msk [vmem:[#allocation2 + $0x68] sm:$0xff] %vm714_vm4, %v1637_v17  ;;  %v2318_v7 = vpop.f32.mrf.mxu2 }
 0x1a0   : > { %v2575_v3 = vpack.c.bf16 %v2543_v0, %v2543_v0  ;;  %v1582_v55 = vpop.f32.mrf.mxu3  ;;  %v2412_v20 = vadd.f32 %v2380_v38, %v2318_v7 }
 0x1a1   : > { %v1652_v5 = vadd.f32 %v1620_v24, %v1582_v55 }
 0x1a2   : > { %2608 = vst.msk [vmem:[%s4071_s16 + $0x2c] sm:$0xf] %vm2596_vm6, %v2575_v3  ;;  %v835_v61 = vpop.f32.mrf.mxu0  ;;  %v1547_v49 = vpop.f32.mrf.mxu1 }
 0x1a3   : > { %1684 = vst.msk [vmem:[#allocation2 + $0xe0] sm:$0xff] %vm714_vm4, %v1652_v5  ;;  %v2393_v5 = vld [vmem:[#allocation2 + $0xc8] sm:$0xff] }
 0x1a4   : > { %2444 = vst.msk [vmem:[#allocation2 + $0x60] sm:$0xff] %vm714_vm4, %v2412_v20 }
 0x1a5   : > { %894 = vst.msk [vmem:[#allocation2 + $0x70] sm:$0xff] %vm714_vm4, %v835_v61 }
 0x1a6   : > { %v2381_v57 = vld [vmem:[#allocation2 + $0x68] sm:$0xff] }
 0x1a7   : > { %v2320_v42 = vpop.f32.mrf.mxu2 }
 0x1a8   : > { %v1584_v2 = vpop.f32.mrf.mxu3  ;;  %v2413_v25 = vadd.f32 %v2381_v57, %v2320_v42 }
 0x1a9   : > { %v1653_v27 = vadd.f32 %v1621_v45, %v1584_v2 }
 0x1aa   : > { %2445 = vst.msk [vmem:[#allocation2 + $0x68] sm:$0xff] %vm714_vm4, %v2413_v25  ;;  %v837_v52 = vpop.f32.mrf.mxu0  ;;  %v1549_v18 = vpop.f32.mrf.mxu1 }
 0x1ab   : > { %v2476_v46 = vld [vmem:[#allocation2 + $0x60] sm:$0xff]  ;;  %1685 = vst.msk [vmem:[#allocation2 + $0xe8] sm:$0xff] %vm714_vm4, %v1653_v27 }
 0x1ac   : > { %v2512_v53 = vadd.f32 %v4056_v13, %v2476_v46  ;;  %v1606_v8 = vld [vmem:[#allocation2 + $0x70] sm:$0xff]  ;;  %895 = vst.msk [vmem:[#allocation2 + $0x78] sm:$0xff] %vm714_vm4, %v837_v52 }
 0x1ad   : > { %v1638_v11 = vadd.f32 %v1606_v8, %v1547_v49 }
 0x1ae   : > { %v2544_v48 = vmax.f32 %v2512_v53, 0.0 }
 0x1af   : > { %1670 = vst.msk [vmem:[#allocation2 + $0x70] sm:$0xff] %vm714_vm4, %v1638_v11 }
 0x1b0   : > { %v2576_v60 = vpack.c.bf16 %v2544_v48, %v2544_v48 }
 0x1b1   : > { %v2477_v31 = vld [vmem:[#allocation2 + $0x68] sm:$0xff]  ;;  %v1587_v34 = vpop.f32.mrf.mxu3 }
 0x1b2   : > { %2609 = vst.msk [vmem:[%s4071_s16 + $0x30] sm:$0xf] %vm2596_vm6, %v2576_v60  ;;  %v2513_v26 = vadd.f32 %v4056_v13, %v2477_v31  ;;  %v1654_v10 = vadd.f32 %v1622_v56, %v1587_v34  ;;  %v840_v19 = vpop.f32.mrf.mxu0 }
 0x1b3   : > { %v1607_v33 = vld [vmem:[#allocation2 + $0x78] sm:$0xff]  ;;  %896 = vst.msk [vmem:[#allocation2 + $0x80] sm:$0xff] %vm714_vm4, %v840_v19 }
 0x1b4   : > { %v2545_v40 = vmax.f32 %v2513_v26, 0.0  ;;  %v1639_v30 = vadd.f32 %v1607_v33, %v1549_v18  ;;  %1686 = vst.msk [vmem:[#allocation2 + $0xf0] sm:$0xff] %vm714_vm4, %v1654_v10 }
 0x1b6   : > { %v2577_v1 = vpack.c.bf16 %v2545_v40, %v2545_v40  ;;  %1671 = vst.msk [vmem:[#allocation2 + $0x78] sm:$0xff] %vm714_vm4, %v1639_v30  ;;  %v2382_v58 = vld [vmem:[#allocation2 + $0x70] sm:$0xff] }
 0x1b7   : > { %v2394_v40 = vld [vmem:[#allocation2 + $0xd0] sm:$0xff] }
 0x1b8   : > { %2610 = vst.msk [vmem:[%s4071_s16 + $0x34] sm:$0xf] %vm2596_vm6, %v2577_v1  ;;  %v2323_v32 = vpop.f32.mrf.mxu2 }
 0x1b9   : > { %v2414_v39 = vadd.f32 %v2382_v58, %v2323_v32  ;;  %v1589_v43 = vpop.f32.mrf.mxu3 }
 0x1ba   : > { %v1655_v54 = vadd.f32 %v1623_v63, %v1589_v43  ;;  %v842_v47 = vpop.f32.mrf.mxu0  ;;  %v1608_v51 = vld [vmem:[#allocation2 + $0x80] sm:$0xff] }
 0x1bb   : > { %2446 = vst.msk [vmem:[#allocation2 + $0x70] sm:$0xff] %vm714_vm4, %v2414_v39  ;;  %v1552_v22 = vpop.f32.mrf.mxu1 }
 0x1bc   : > { %1687 = vst.msk [vmem:[#allocation2 + $0xf8] sm:$0xff] %vm714_vm4, %v1655_v54  ;;  %v1640_v50 = vadd.f32 %v1608_v51, %v1552_v22  ;;  %v2395_v54 = vld [vmem:[#allocation2 + $0xd8] sm:$0xff] }
 0x1bd   : > { %897 = vst.msk [vmem:[#allocation2 + $0x88] sm:$0xff] %vm714_vm4, %v842_v47  ;;  %v2383_v62 = vld [vmem:[#allocation2 + $0x78] sm:$0xff] }
 0x1be   : > { %1672 = vst.msk [vmem:[#allocation2 + $0x80] sm:$0xff] %vm714_vm4, %v1640_v50 }
 0x1c0   : > { %v2325_v21 = vpop.f32.mrf.mxu2 }
 0x1c1   : > { %v2415_v15 = vadd.f32 %v2383_v62, %v2325_v21 }
 0x1c2   : > { %v2478_v14 = vld [vmem:[#allocation2 + $0x70] sm:$0xff] }
 0x1c3   : > { %v2514_v29 = vadd.f32 %v4056_v13, %v2478_v14  ;;  %2447 = vst.msk [vmem:[#allocation2 + $0x78] sm:$0xff] %vm714_vm4, %v2415_v15  ;;  %v1554_v41 = vpop.f32.mrf.mxu1 }
 0x1c4   : > { %v1609_v23 = vld [vmem:[#allocation2 + $0x88] sm:$0xff] }
 0x1c5   : > { %v2546_v59 = vmax.f32 %v2514_v29, 0.0  ;;  %v1641_v35 = vadd.f32 %v1609_v23, %v1554_v41  ;;  %v2384_v9 = vld [vmem:[#allocation2 + $0x80] sm:$0xff] }
 0x1c7   : > { %v2578_v37 = vpack.c.bf16 %v2546_v59, %v2546_v59  ;;  %1673 = vst.msk [vmem:[#allocation2 + $0x88] sm:$0xff] %vm714_vm4, %v1641_v35 }
 0x1c8   : > { %v2328_v28 = vpop.f32.mrf.mxu2 }
 0x1c9   : > { %2611 = vst.msk [vmem:[%s4071_s16 + $0x38] sm:$0xf] %vm2596_vm6, %v2578_v37  ;;  %v2416_v4 = vadd.f32 %v2384_v9, %v2328_v28  ;;  %v2348_v44 = vpop.f32.mrf.mxu3 }
 0x1ca   : > { %v2479_v12 = vld [vmem:[#allocation2 + $0x78] sm:$0xff]  ;;  %v2424_v6 = vadd.f32 %v2392_v16, %v2348_v44 }
 0x1cb   : > { %v2515_v36 = vadd.f32 %v4056_v13, %v2479_v12  ;;  %2448 = vst.msk [vmem:[#allocation2 + $0x80] sm:$0xff] %vm714_vm4, %v2416_v4  ;;  %v845_v17 = vpop.f32.mrf.mxu0 }
 0x1cc   : > { %2456 = vst.msk [vmem:[#allocation2 + $0xc0] sm:$0xff] %vm714_vm4, %v2424_v6 }
 0x1cd   : > { %v2547_v0 = vmax.f32 %v2515_v36, 0.0  ;;  %898 = vst.msk [vmem:[#allocation2 + $0x90] sm:$0xff] %vm714_vm4, %v845_v17 }
 0x1ce   : > { %v2385_v3 = vld [vmem:[#allocation2 + $0x88] sm:$0xff] }
 0x1cf   : > { %v2579_v7 = vpack.c.bf16 %v2547_v0, %v2547_v0 }
 0x1d0   : > { %v2330_v38 = vpop.f32.mrf.mxu2 }
 0x1d1   : > { %2612 = vst.msk [vmem:[%s4071_s16 + $0x3c] sm:$0xf] %vm2596_vm6, %v2579_v7  ;;  %v2417_v55 = vadd.f32 %v2385_v3, %v2330_v38  ;;  %v2350_v20 = vpop.f32.mrf.mxu3 }
 0x1d2   : > { %v2480_v24 = vld [vmem:[#allocation2 + $0x80] sm:$0xff]  ;;  %v2425_v42 = vadd.f32 %v2393_v5, %v2350_v20  ;;  %v1557_v57 = vpop.f32.mrf.mxu1 }
 0x1d3   : > { %v2516_v61 = vadd.f32 %v4056_v13, %v2480_v24  ;;  %2449 = vst.msk [vmem:[#allocation2 + $0x88] sm:$0xff] %vm714_vm4, %v2417_v55  ;;  %v2488_v2 = vld [vmem:[#allocation2 + $0xc0] sm:$0xff]  ;;  %v847_v45 = vpop.f32.mrf.mxu0 }
 0x1d4   : > { %v2524_v49 = vadd.f32 %v4056_v13, %v2488_v2  ;;  %2457 = vst.msk [vmem:[#allocation2 + $0xc8] sm:$0xff] %vm714_vm4, %v2425_v42  ;;  %v1610_v27 = vld [vmem:[#allocation2 + $0x90] sm:$0xff]  ;;  %v2396_v42 = vld [vmem:[#allocation2 + $0xe0] sm:$0xff] }
 0x1d5   : > { %v2548_v25 = vmax.f32 %v2516_v61, 0.0  ;;  %v1642_v52 = vadd.f32 %v1610_v27, %v1557_v57  ;;  %899 = vst.msk [vmem:[#allocation2 + $0x98] sm:$0xff] %vm714_vm4, %v847_v45 }
 0x1d6   : > { %v2556_v53 = vmax.f32 %v2524_v49, 0.0 }
 0x1d7   : > { %v2580_v46 = vpack.c.bf16 %v2548_v25, %v2548_v25  ;;  %1674 = vst.msk [vmem:[#allocation2 + $0x90] sm:$0xff] %vm714_vm4, %v1642_v52 }
 0x1d8   : > { %v2588_v8 = vpack.c.bf16 %v2556_v53, %v2556_v53 }
 0x1d9   : > { %2613 = vst.msk [vmem:[%s4071_s16 + $0x40] sm:$0xf] %vm2596_vm6, %v2580_v46 }
 0x1da   : > { %v2481_v11 = vld [vmem:[#allocation2 + $0x88] sm:$0xff]  ;;  %2621 = vst.msk [vmem:[%s4071_s16 + $0x60] sm:$0xf] %vm2596_vm6, %v2588_v8  ;;  %v1559_v60 = vpop.f32.mrf.mxu1 }
 0x1db   : > { %v2517_v48 = vadd.f32 %v4056_v13, %v2481_v11  ;;  %v2489_v31 = vld [vmem:[#allocation2 + $0xc8] sm:$0xff] }
 0x1dc   : > { %v2525_v56 = vadd.f32 %v4056_v13, %v2489_v31  ;;  %v1611_v26 = vld [vmem:[#allocation2 + $0x98] sm:$0xff] }
 0x1dd   : > { %v2549_v34 = vmax.f32 %v2517_v48, 0.0  ;;  %v1643_v10 = vadd.f32 %v1611_v26, %v1559_v60  ;;  %v2397_v48 = vld [vmem:[#allocation2 + $0xe8] sm:$0xff] }
 0x1de   : > { %v2557_v18 = vmax.f32 %v2525_v56, 0.0  ;;  %v2386_v58 = vld [vmem:[#allocation2 + $0x90] sm:$0xff] }
 0x1df   : > { %v2581_v19 = vpack.c.bf16 %v2549_v34, %v2549_v34  ;;  %v2353_v33 = vpop.f32.mrf.mxu3  ;;  %1675 = vst.msk [vmem:[#allocation2 + $0x98] sm:$0xff] %vm714_vm4, %v1643_v10 }
 0x1e0   : > { %v2426_v30 = vadd.f32 %v2394_v40, %v2353_v33  ;;  %v2589_v1 = vpack.c.bf16 %v2557_v18, %v2557_v18  ;;  %v2333_v32 = vpop.f32.mrf.mxu2 }
 0x1e1   : > { %2614 = vst.msk [vmem:[%s4071_s16 + $0x44] sm:$0xf] %vm2596_vm6, %v2581_v19  ;;  %v2418_v39 = vadd.f32 %v2386_v58, %v2333_v32 }
 0x1e2   : > { %2458 = vst.msk [vmem:[#allocation2 + $0xd0] sm:$0xff] %vm714_vm4, %v2426_v30  ;;  %v850_v43 = vpop.f32.mrf.mxu0  ;;  %v1562_v62 = vpop.f32.mrf.mxu1 }
 0x1e3   : > { %2622 = vst.msk [vmem:[%s4071_s16 + $0x64] sm:$0xf] %vm2596_vm6, %v2589_v1 }
 0x1e4   : > { %2450 = vst.msk [vmem:[#allocation2 + $0x90] sm:$0xff] %vm714_vm4, %v2418_v39 }
 0x1e5   : > { %900 = vst.msk [vmem:[#allocation2 + $0xa0] sm:$0xff] %vm714_vm4, %v850_v43 }
 0x1e6   : > { %v2387_v50 = vld [vmem:[#allocation2 + $0x98] sm:$0xff] }
 0x1e7   : > { %v2355_v63 = vpop.f32.mrf.mxu3 }
 0x1e8   : > { %v2427_v47 = vadd.f32 %v2395_v54, %v2355_v63  ;;  %v2335_v22 = vpop.f32.mrf.mxu2  ;;  %v2398_v63 = vld [vmem:[#allocation2 + $0xf0] sm:$0xff] }
 0x1e9   : > { %v2490_v51 = vld [vmem:[#allocation2 + $0xd0] sm:$0xff]  ;;  %v2419_v15 = vadd.f32 %v2387_v50, %v2335_v22 }
 0x1ea   : > { %v2526_v21 = vadd.f32 %v4056_v13, %v2490_v51  ;;  %2459 = vst.msk [vmem:[#allocation2 + $0xd8] sm:$0xff] %vm714_vm4, %v2427_v47  ;;  %v852_v29 = vpop.f32.mrf.mxu0  ;;  %v1564_v17 = vpop.f32.mrf.mxu1 }
 0x1eb   : > { %v2482_v14 = vld [vmem:[#allocation2 + $0x90] sm:$0xff]  ;;  %2451 = vst.msk [vmem:[#allocation2 + $0x98] sm:$0xff] %vm714_vm4, %v2419_v15 }
 0x1ec   : > { %v2518_v41 = vadd.f32 %v4056_v13, %v2482_v14  ;;  %v2558_v23 = vmax.f32 %v2526_v21, 0.0  ;;  %v1612_v59 = vld [vmem:[#allocation2 + $0xa0] sm:$0xff]  ;;  %901 = vst.msk [vmem:[#allocation2 + $0xa8] sm:$0xff] %vm714_vm4, %v852_v29 }
 0x1ed   : > { %v1644_v35 = vadd.f32 %v1612_v59, %v1562_v62  ;;  %v2399_v59 = vld [vmem:[#allocation2 + $0xf8] sm:$0xff] }
 0x1ee   : > { %v2550_v37 = vmax.f32 %v2518_v41, 0.0  ;;  %v2590_v28 = vpack.c.bf16 %v2558_v23, %v2558_v23 }
 0x1ef   : > { %1676 = vst.msk [vmem:[#allocation2 + $0xa0] sm:$0xff] %vm714_vm4, %v1644_v35 }
 0x1f0   : > { %v2582_v9 = vpack.c.bf16 %v2550_v37, %v2550_v37  ;;  %2623 = vst.msk [vmem:[%s4071_s16 + $0x68] sm:$0xf] %vm2596_vm6, %v2590_v28 }
 0x1f1   : > { %v2491_v4 = vld [vmem:[#allocation2 + $0xd8] sm:$0xff]  ;;  %v2338_v7 = vpop.f32.mrf.mxu2 }
 0x1f2   : > { %2615 = vst.msk [vmem:[%s4071_s16 + $0x48] sm:$0xf] %vm2596_vm6, %v2582_v9  ;;  %v2527_v12 = vadd.f32 %v4056_v13, %v2491_v4  ;;  %v2483_v44 = vld [vmem:[#allocation2 + $0x98] sm:$0xff]  ;;  %v855_v16 = vpop.f32.mrf.mxu0 }
 0x1f3   : > { %v2519_v36 = vadd.f32 %v4056_v13, %v2483_v44  ;;  %v1613_v0 = vld [vmem:[#allocation2 + $0xa8] sm:$0xff]  ;;  %902 = vst.msk [vmem:[#allocation2 + $0xb0] sm:$0xff] %vm714_vm4, %v855_v16 }
 0x1f4   : > { %v2559_v6 = vmax.f32 %v2527_v12, 0.0  ;;  %v1645_v38 = vadd.f32 %v1613_v0, %v1564_v17 }
 0x1f5   : > { %v2551_v3 = vmax.f32 %v2519_v36, 0.0 }
 0x1f6   : > { %v2591_v55 = vpack.c.bf16 %v2559_v6, %v2559_v6  ;;  %v2388_v24 = vld [vmem:[#allocation2 + $0xa0] sm:$0xff]  ;;  %1677 = vst.msk [vmem:[#allocation2 + $0xa8] sm:$0xff] %vm714_vm4, %v1645_v38 }
 0x1f7   : > { %v2420_v20 = vadd.f32 %v2388_v24, %v2338_v7  ;;  %v2583_v5 = vpack.c.bf16 %v2551_v3, %v2551_v3 }
 0x1f8   : > { %2624 = vst.msk [vmem:[%s4071_s16 + $0x6c] sm:$0xf] %vm2596_vm6, %v2591_v55  ;;  %v2358_v61 = vpop.f32.mrf.mxu3 }
 0x1f9   : > { %2452 = vst.msk [vmem:[#allocation2 + $0xa0] sm:$0xff] %vm714_vm4, %v2420_v20  ;;  %v2428_v57 = vadd.f32 %v2396_v42, %v2358_v61  ;;  %v2340_v27 = vpop.f32.mrf.mxu2 }
 0x1fa   : > { %2616 = vst.msk [vmem:[%s4071_s16 + $0x4c] sm:$0xf] %vm2596_vm6, %v2583_v5  ;;  %v857_v2 = vpop.f32.mrf.mxu0  ;;  %v1614_v45 = vld [vmem:[#allocation2 + $0xb0] sm:$0xff] }
 0x1fb   : > { %2460 = vst.msk [vmem:[#allocation2 + $0xe0] sm:$0xff] %vm714_vm4, %v2428_v57  ;;  %v1567_v25 = vpop.f32.mrf.mxu1 }
 0x1fc   : > { %903 = vst.msk [vmem:[#allocation2 + $0xb8] sm:$0xff] %vm714_vm4, %v857_v2  ;;  %v1646_v49 = vadd.f32 %v1614_v45, %v1567_v25 }
 0x1fd   : > { %v2389_v52 = vld [vmem:[#allocation2 + $0xa8] sm:$0xff] }
 0x1fe   : > { %v2421_v46 = vadd.f32 %v2389_v52, %v2340_v27  ;;  %1678 = vst.msk [vmem:[#allocation2 + $0xb0] sm:$0xff] %vm714_vm4, %v1646_v49 }
 0x200   : > { %v2484_v53 = vld [vmem:[#allocation2 + $0xa0] sm:$0xff]  ;;  %2453 = vst.msk [vmem:[#allocation2 + $0xa8] sm:$0xff] %vm714_vm4, %v2421_v46  ;;  %v2360_v11 = vpop.f32.mrf.mxu3 }
 0x201   : > { %v2520_v8 = vadd.f32 %v4056_v13, %v2484_v53  ;;  %v2429_v60 = vadd.f32 %v2397_v48, %v2360_v11 }
 0x202   : > { %v2492_v34 = vld [vmem:[#allocation2 + $0xe0] sm:$0xff] }
 0x203   : > { %v2552_v31 = vmax.f32 %v2520_v8, 0.0  ;;  %v2528_v56 = vadd.f32 %v4056_v13, %v2492_v34  ;;  %2461 = vst.msk [vmem:[#allocation2 + $0xe8] sm:$0xff] %vm714_vm4, %v2429_v60  ;;  %v1569_v26 = vpop.f32.mrf.mxu1  ;;  %v1615_v10 = vld [vmem:[#allocation2 + $0xb8] sm:$0xff] }
 0x204   : > { %v1647_v18 = vadd.f32 %v1615_v10, %v1569_v26 }
 0x205   : > { %v2584_v19 = vpack.c.bf16 %v2552_v31, %v2552_v31  ;;  %v2560_v33 = vmax.f32 %v2528_v56, 0.0  ;;  %v2390_v30 = vld [vmem:[#allocation2 + $0xb0] sm:$0xff] }
 0x206   : > { %1679 = vst.msk [vmem:[#allocation2 + $0xb8] sm:$0xff] %vm714_vm4, %v1647_v18 }
 0x207   : > { %2617 = vst.msk [vmem:[%s4071_s16 + $0x50] sm:$0xf] %vm2596_vm6, %v2584_v19  ;;  %v2343_v40 = vpop.f32.mrf.mxu2  ;;  %v2592_v1 = vpack.c.bf16 %v2560_v33, %v2560_v33  ;;  %v2485_v32 = vld [vmem:[#allocation2 + $0xa8] sm:$0xff] }
 0x208   : > { %v2422_v58 = vadd.f32 %v2390_v30, %v2343_v40  ;;  %v2521_v39 = vadd.f32 %v4056_v13, %v2485_v32 }
 0x209   : > { %2625 = vst.msk [vmem:[%s4071_s16 + $0x70] sm:$0xf] %vm2596_vm6, %v2592_v1  ;;  %v2363_v43 = vpop.f32.mrf.mxu3 }
 0x20a   : > { %v2553_v54 = vmax.f32 %v2521_v39, 0.0  ;;  %v2493_v47 = vld [vmem:[#allocation2 + $0xe8] sm:$0xff]  ;;  %2454 = vst.msk [vmem:[#allocation2 + $0xb0] sm:$0xff] %vm714_vm4, %v2422_v58  ;;  %v2430_v51 = vadd.f32 %v2398_v63, %v2363_v43 }
 0x20b   : > { %v2529_v22 = vadd.f32 %v4056_v13, %v2493_v47  ;;  %v3174_v13 = vld [vmem:[%s4324_s2] ss:$0 sm:$0xff] }
 0x20c   : > { %v2585_v50 = vpack.c.bf16 %v2553_v54, %v2553_v54  ;;  %2462 = vst.msk [vmem:[#allocation2 + $0xf0] sm:$0xff] %vm714_vm4, %v2430_v51 }
 0x20d   : > { %v2561_v21 = vmax.f32 %v2529_v22, 0.0  ;;  %v2391_v15 = vld [vmem:[#allocation2 + $0xb8] sm:$0xff] }
 0x20e   : > { %2618 = vst.msk [vmem:[%s4071_s16 + $0x54] sm:$0xf] %vm2596_vm6, %v2585_v50 }
 0x20f   : > { %v2345_v62 = vpop.f32.mrf.mxu2  ;;  %v2593_v14 = vpack.c.bf16 %v2561_v21, %v2561_v21 }
 0x210   : > { %v2423_v29 = vadd.f32 %v2391_v15, %v2345_v62 }
 0x211   : > { %2626 = vst.msk [vmem:[%s4071_s16 + $0x74] sm:$0xf] %vm2596_vm6, %v2593_v14  ;;  %v2486_v41 = vld [vmem:[#allocation2 + $0xb0] sm:$0xff]  ;;  %v2365_v23 = vpop.f32.mrf.mxu3 }
 0x212   : > { %v2522_v35 = vadd.f32 %v3174_v13, %v2486_v41  ;;  %2455 = vst.msk [vmem:[#allocation2 + $0xb8] sm:$0xff] %vm714_vm4, %v2423_v29  ;;  %v2431_v37 = vadd.f32 %v2399_v59, %v2365_v23 }
 0x213   : > { %v2494_v28 = vld [vmem:[#allocation2 + $0xf0] sm:$0xff] }
 0x214   : > { %v2554_v9 = vmax.f32 %v2522_v35, 0.0  ;;  %v2530_v4 = vadd.f32 %v3174_v13, %v2494_v28  ;;  %2463 = vst.msk [vmem:[#allocation2 + $0xf8] sm:$0xff] %vm714_vm4, %v2431_v37 }
 0x216   : > { %v2586_v12 = vpack.c.bf16 %v2554_v9, %v2554_v9  ;;  %v2562_v44 = vmax.f32 %v2530_v4, 0.0 }
 0x218   : > { %2619 = vst.msk [vmem:[%s4071_s16 + $0x58] sm:$0xf] %vm2596_vm6, %v2586_v12  ;;  %v2594_v16 = vpack.c.bf16 %v2562_v44, %v2562_v44 }
 0x219   : > { %v2487_v36 = vld [vmem:[#allocation2 + $0xb8] sm:$0xff] }
 0x21a   : > { %2627 = vst.msk [vmem:[%s4071_s16 + $0x78] sm:$0xf] %vm2596_vm6, %v2594_v16  ;;  %v2523_v6 = vadd.f32 %v3174_v13, %v2487_v36 }
 0x21b   : > { %v2495_v17 = vld [vmem:[#allocation2 + $0xf8] sm:$0xff] }
 0x21c   : > { %v2555_v0 = vmax.f32 %v2523_v6, 0.0  ;;  %v2531_v7 = vadd.f32 %v3174_v13, %v2495_v17 }
 0x21e   : > { %v2587_v38 = vpack.c.bf16 %v2555_v0, %v2555_v0  ;;  %v2563_v3 = vmax.f32 %v2531_v7, 0.0 }
 0x220   : > { %2620 = vst.msk [vmem:[%s4071_s16 + $0x5c] sm:$0xf] %vm2596_vm6, %v2587_v38  ;;  %v2595_v55 = vpack.c.bf16 %v2563_v3, %v2563_v3 }
 0x222   : > { %2628 = vst.msk [vmem:[%s4071_s16 + $0x7c] sm:$0xf] %vm2596_vm6, %v2595_v55 }
 0x223 PF: > { %s13_s14 = sadd.s32 1, %s3197_s14   ;;  %s4326_s12 = smov %s3193_s13 }
 0x224   : > { %p10_p5 = scmp.ge.s32.totalorder %s13_s14, 4   ;;  %s4327_s13 = smov %s4329_s15 }
 0x226   :  { %12 = sbr.rel (!%p10_p5) target bundleno = 2 (0x2), region = 67 }

</bundles_post_ra>
